<compile_context>
chip_gen: v5e
topology: v5e:2x2
jax: 0.10.0
libtpu: 0.0.40
codegen_flags: <defaults>
</compile_context>

<pallas_src>
from functools import partial

import numpy as np
import jax
import jax.numpy as jnp
from jax import lax
from jax.experimental import pallas as pl
from jax.experimental.pallas import tpu as pltpu

EPS = 1e-5          # nn.BatchNorm2d default eps
NEG_SLOPE = 0.01    # nn.LeakyReLU default negative_slope


# ----------------------------- Pallas kernel ------------------------------- #

def _duelcnn_fused_kernel(p1_ref, w1_ref, b1_ref, w2_ref, b2_ref,
                          w3_ref, b3_ref, wav1_ref, bav1_ref,
                          wout_ref, bout_ref, q_ref,
                          h1_ref, h1p_ref, h2_ref, h2p_ref):
    f32 = jnp.float32
    cdt = w1_ref.dtype                    # matmul operand dtype (f32 / bf16)
    B, O = q_ref.shape
    oc1 = w1_ref.shape[1]                 # 32 conv1 output channels
    oc2 = w2_ref.shape[1]                 # 64 conv2 output channels
    n_taps = w2_ref.shape[0] // oc1       # 16 conv2 kernel taps (4x4)
    n_pos = w3_ref.shape[0] // oc2        # 9 conv2 output positions (3x3)
    rows2 = n_pos * B                     # 18 rows per tap block / conv2 rows

    # conv1(+BN1)+ReLU: ONE (B*9*16, 256) x (256, 32) matmul, single bias/ReLU.
    # p1 rows are ordered (tap, pos, b); columns are (cin, kh1, kw1).
    h1 = jnp.dot(p1_ref[...], w1_ref[...], preferred_element_type=f32)
    h1_ref[...] = jnp.maximum(h1 + b1_ref[...], 0.0)            # (288, 32) f32

    # Relayout for conv2: per-tap row blocks -> lane blocks, so each (pos, b)
    # row carries K = (tap, cin) == w2's row order.  16 tiny static VMEM
    # copies (ref load + masked ref store) instead of a value reshape.
    for t in range(n_taps):
        h1p_ref[:, t * oc1:(t + 1) * oc1] = h1_ref[t * rows2:(t + 1) * rows2, :]

    # conv2(+BN2)+ReLU: ONE (18, 512) x (512, 64) matmul.
    h2 = jnp.dot(h1p_ref[...].astype(cdt), w2_ref[...],
                 preferred_element_type=f32)
    h2_ref[...] = jnp.maximum(h2 + b2_ref[...], 0.0)            # (18, 64) f32

    # Relayout for conv3: per-position row blocks -> lane blocks, so each batch
    # row carries K = (pos, cin) == w3's row order.
    for p in range(n_pos):
        h2p_ref[:, p * oc2:(p + 1) * oc2] = h2_ref[p * B:(p + 1) * B, :]

    # conv3(+BN3)+ReLU: the 3x3 -> 1x1 conv is ONE (B, 576) x (576, 64) matmul.
    feat = jnp.dot(h2p_ref[...].astype(cdt), w3_ref[...],
                   preferred_element_type=f32)
    feat = jnp.maximum(feat + b3_ref[...], 0.0).astype(cdt)      # (B, 64)

    # Dueling head: A|V first layers merged into one lane-dense (64, 256)
    # matmul; A|V second layers merged into one block-diagonal (256, O+1)
    # matmul whose last column is V.
    h4 = jnp.dot(feat, wav1_ref[...], preferred_element_type=f32) + bav1_ref[...]
    h4 = jnp.where(h4 > 0, h4, NEG_SLOPE * h4).astype(cdt)       # LeakyReLU (f32 math)
    qa = jnp.dot(h4, wout_ref[...], preferred_element_type=f32) + bout_ref[...]
    ax = qa[:, :O]                                               # (B, O)
    vx = qa[:, O:O + 1]                                          # (B, 1)
    # q = Vx + (Ax - Ax.mean())  -- mean over ALL (B, O) elements (torch semantics)
    q_ref[...] = vx + (ax - jnp.mean(ax))


# ------------------------------- JAX glue ---------------------------------- #

def _conv1_patch_rows(x, cdt):
    """NCHW input -> (KH2*KW2*H2*W2*B, C*KH1*KW1) conv1 im2col patch matrix.

    Row r = ((kh2*4 + kw2) * 9 + (oh2*3 + ow2)) * B + b holds the conv1 input
    patch at conv1-output position (2*oh2 + kh2, 2*ow2 + kw2) of sample b,
    flattened in (cin, kh1, kw1) order, i.e. rows are (tap, pos, b)-ordered so
    the fused kernel needs only static contiguous slices.
    """
    B, C, H, W = x.shape
    K1, S1 = 8, 4
    H1, W1 = (H - K1) // S1 + 1, (W - K1) // S1 + 1
    K2, S2 = 4, 2
    H2, W2 = (H1 - K2) // S2 + 1, (W1 - K2) // S2 + 1

    # Cast to the matmul operand dtype FIRST (halves all downstream traffic),
    # and put conv1 positions leading / batch next so the final gather already
    # emits rows in (tap, pos, b) order with no extra transpose.
    xt = x.astype(cdt).transpose(2, 3, 0, 1)                     # (H, W, B, C)
    cols = []
    for i in range(K1):
        for j in range(K1):
            cols.append(xt[i:i + S1 * H1:S1, j:j + S1 * W1:S1])  # (H1, W1, B, C)
    p = jnp.stack(cols, axis=-1)                                 # (H1, W1, B, C, 64)
    p = p.reshape(H1, W1, B, C * K1 * K1)                        # cols (cin, kh1, kw1)

    kh2, kw2, oh2, ow2 = np.meshgrid(np.arange(K2), np.arange(K2),
                                     np.arange(H2), np.arange(W2), indexing="ij")
    r1 = (S2 * oh2 + kh2).reshape(-1)                            # (144,) (tap, pos)
    c1 = (S2 * ow2 + kw2).reshape(-1)
    sel = p[r1, c1]                                              # (144, B, 256)
    return sel.reshape(K2 * K2 * H2 * W2 * B, C * K1 * K1)       # (288, 256)


@partial(jax.jit, static_argnames=("compute_dtype",))
def duelcnn_forward(x, kparams, *, compute_dtype=jnp.bfloat16):
    B = x.shape[0]
    cdt = compute_dtype

    p1 = _conv1_patch_rows(x, cdt)                               # (B*9*16, 256)

    w1 = kparams["w1"].astype(cdt); b1 = kparams["b1"]
    w2 = kparams["w2"].astype(cdt); b2 = kparams["b2"]
    w3 = kparams["w3"].astype(cdt); b3 = kparams["b3"]
    wav1 = kparams["wav1"].astype(cdt); bav1 = kparams["bav1"]
    wout = kparams["wout"].astype(cdt); bout = kparams["bout"]

    oc1 = w1.shape[1]
    oc2 = w2.shape[1]
    n_taps = w2.shape[0] // oc1
    n_pos = w3.shape[0] // oc2
    O = bout.shape[1] - 1
    assert p1.shape[0] == B * n_pos * n_taps

    args = (p1, w1, b1, w2, b2, w3, b3, wav1, bav1, wout, bout)

    # Grid-less call: whole arrays live in VMEM (total residency < 1 MiB), no
    # pipelining prologue/epilogue.  At B=2 the batch is not sharded across
    # TensorCores (Ax.mean() couples the batch and the kernel is latency-bound).
    return pl.pallas_call(
        _duelcnn_fused_kernel,
        out_shape=jax.ShapeDtypeStruct((B, O), jnp.float32),
        in_specs=[pl.BlockSpec(memory_space=pltpu.MemorySpace.VMEM)
                  for _ in args],
        out_specs=pl.BlockSpec(memory_space=pltpu.MemorySpace.VMEM),
        scratch_shapes=[
            pltpu.VMEM((B * n_pos * n_taps, oc1), jnp.float32),   # h1   (288, 32)
            pltpu.VMEM((B * n_pos, n_taps * oc1), jnp.float32),   # h1p  (18, 512)
            pltpu.VMEM((B * n_pos, oc2), jnp.float32),            # h2   (18, 64)
            pltpu.VMEM((B, n_pos * oc2), jnp.float32),            # h2p  (B, 576)
        ],
    )(*args)


# ----------------------------- Parameters ---------------------------------- #

def init_params(key, h, w, output_size):
    ks = iter(jax.random.split(key, 32))

    def nrm(shape, scale):
        return jax.random.normal(next(ks), shape, dtype=jnp.float32) * scale

    def conv_size(s, k, st):
        return (s - (k - 1) - 1) // st + 1

    raw = {}
    ch, cw = h, w
    for name, cin, cout, ksz, st in (("c1", 4, 32, 8, 4),
                                     ("c2", 32, 64, 4, 2),
                                     ("c3", 64, 64, 3, 1)):
        fan_in = cin * ksz * ksz
        wconv = nrm((cout, cin, ksz, ksz), 1.0 / np.sqrt(fan_in))
        cb = nrm((cout,), 0.05)
        gamma = 1.0 + nrm((cout,), 0.1)
        beta = nrm((cout,), 0.1)
        rmean = nrm((cout,), 0.1)
        rvar = jax.random.uniform(next(ks), (cout,), minval=0.5, maxval=1.5,
                                  dtype=jnp.float32)
        raw[name] = (wconv, cb, gamma, beta, rmean, rvar)
        ch, cw = conv_size(ch, ksz, st), conv_size(cw, ksz, st)

    if (ch, cw) != (1, 1):
        raise ValueError("fused kernel assumes the conv stack reduces spatial "
                         f"extent to 1x1 (got {ch}x{cw}); use h = w = 36")
    lin_in = ch * cw * 64

    aw1 = nrm((128, lin_in), 1.0 / np.sqrt(lin_in)); ab1 = nrm((128,), 0.05)
    aw2 = nrm((output_size, 128), 1.0 / np.sqrt(128)); ab2 = nrm((output_size,), 0.05)
    vw1 = nrm((128, lin_in), 1.0 / np.sqrt(lin_in)); vb1 = nrm((128,), 0.05)
    vw2 = nrm((1, 128), 1.0 / np.sqrt(128)); vb2 = nrm((1,), 0.05)
    raw["head"] = (aw1, ab1, aw2, ab2, vw1, vb1, vw2, vb2)

    # ---- fold eval-mode BN (+ conv bias) into matmul weights / biases -------
    def fold_khkwc(wconv, cb, gamma, beta, rmean, rvar):
        # rows flattened in (kh, kw, cin) order; BN scale folded into columns
        cout = wconv.shape[0]
        scale = gamma / jnp.sqrt(rvar + EPS)
        bias = ((cb - rmean) * scale + beta).reshape(1, cout)
        wmat = (wconv.transpose(2, 3, 1, 0) * scale).reshape(-1, cout)
        return wmat, bias

    w2k, b2k = fold_khkwc(*raw["c2"])                      # (16*32, 64), (1, 64)
    w3k, b3k = fold_khkwc(*raw["c3"])                      # (9*64, 64),  (1, 64)

    # conv1 patches are flattened in (cin, kh, kw) order, so keep OIHW order:
    wc1, cb1, g1, be1, m1, v1 = raw["c1"]
    s1 = g1 / jnp.sqrt(v1 + EPS)
    w1k = wc1.reshape(wc1.shape[0], -1).T * s1[None, :]    # (256, 32)
    b1k = ((cb1 - m1) * s1 + be1).reshape(1, -1)           # (1, 32)

    # Dueling head: merge A|V first layers (lane-dense) and build a
    # block-diagonal second-layer weight so one matmul yields [Ax | Vx].
    wav1 = jnp.concatenate([aw1.T, vw1.T], axis=1)         # (64, 256)
    bav1 = jnp.concatenate([ab1, vb1]).reshape(1, -1)      # (1, 256)
    wout = jnp.zeros((256, output_size + 1), jnp.float32)
    wout = wout.at[:128, :output_size].set(aw2.T)          # A branch columns
    wout = wout.at[128:, output_size:].set(vw2.T)          # V branch column
    bout = jnp.concatenate([ab2, vb2]).reshape(1, -1)      # (1, O+1)

    kparams = dict(
        w1=w1k, b1=b1k, w2=w2k, b2=b2k, w3=w3k, b3=b3k,
        wav1=wav1, bav1=bav1, wout=wout, bout=bout,
    )
    return kparams, raw


# ------------------------------ Reference ----------------------------------- #

def reference_forward(x, raw):
    """Pure-JAX reference mirroring the PyTorch forward (eval-mode BN)."""
    def bn(y, g, b, m, v):
        sh = (1, -1, 1, 1)
        return (y - m.reshape(sh)) / jnp.sqrt(v.reshape(sh) + EPS) * g.reshape(sh) \
            + b.reshape(sh)

    h = x
    for name, st in (("c1", 4), ("c2", 2), ("c3", 1)):
        wconv, cb, g, b, m, v = raw[name]
        y = lax.conv_general_dilated(h, wconv, (st, st), "VALID",
                                     dimension_numbers=("NCHW", "OIHW", "NCHW"))
        y = y + cb.reshape(1, -1, 1, 1)
        h = jnp.maximum(bn(y, g, b, m, v), 0.0)
    feat = h.reshape(h.shape[0], -1)
    aw1, ab1, aw2, ab2, vw1, vb1, vw2, vb2 = raw["head"]
    lrelu = lambda z: jnp.where(z > 0, z, NEG_SLOPE * z)
    ax = lrelu(feat @ aw1.T + ab1) @ aw2.T + ab2
    vx = lrelu(feat @ vw1.T + vb1) @ vw2.T + vb2
    return vx + (ax - ax.mean())


if __name__ == "__main__":
    key = jax.random.PRNGKey(0)
    B, C, H, W = 2, 4, 36, 36          # conv chain: 36 -> 8 -> 3 -> 1
    output_size = 6                     # Pong action space
    k_x, k_p = jax.random.split(key)
    x = jax.random.normal(k_x, (B, C, H, W), dtype=jnp.float32)
    kparams, raw = init_params(k_p, H, W, output_size)

    q_ref = jax.block_until_ready(reference_forward(x, raw))

    # f32 MXU-operand path (exact up to accumulation order).
    q = jax.block_until_ready(
        duelcnn_forward(x, kparams, compute_dtype=jnp.float32))
    assert q.shape == (B, output_size)
    np.testing.assert_allclose(np.asarray(q), np.asarray(q_ref),
                               rtol=1e-3, atol=1e-3)

    # Default bf16 MXU-operand path: f32 accumulation, f32 elementwise math.
    q_bf16 = jax.block_until_ready(duelcnn_forward(x, kparams))
    np.testing.assert_allclose(np.asarray(q_bf16), np.asarray(q_ref),
                               rtol=5e-2, atol=5e-2)

    print("KERNEL_OK")
</pallas_src>

<mosaic_0001>
module attributes {stable_mosaic.version = 11 : i64} {
  func.func @_duelcnn_fused_kernel(%arg0: memref<288x256xf32, #tpu.memory_space<vmem>>, %arg1: memref<256x32xf32, #tpu.memory_space<vmem>>, %arg2: memref<1x32xf32, #tpu.memory_space<vmem>>, %arg3: memref<512x64xf32, #tpu.memory_space<vmem>>, %arg4: memref<1x64xf32, #tpu.memory_space<vmem>>, %arg5: memref<576x64xf32, #tpu.memory_space<vmem>>, %arg6: memref<1x64xf32, #tpu.memory_space<vmem>>, %arg7: memref<64x256xf32, #tpu.memory_space<vmem>>, %arg8: memref<1x256xf32, #tpu.memory_space<vmem>>, %arg9: memref<256x7xf32, #tpu.memory_space<vmem>>, %arg10: memref<1x7xf32, #tpu.memory_space<vmem>>, %arg11: memref<2x6xf32, #tpu.memory_space<vmem>>, %arg12: memref<288x32xf32, #tpu.memory_space<vmem>>, %arg13: memref<18x512xf32, #tpu.memory_space<vmem>>, %arg14: memref<18x64xf32, #tpu.memory_space<vmem>>, %arg15: memref<2x576xf32, #tpu.memory_space<vmem>>) attributes {dimension_semantics = [], scalar_prefetch = 0 : i64, scratch_operands = 4 : i64, tpu.core_type = #tpu.core_type<tc>} {
    %c0 = arith.constant 0 : index
    %c0_0 = arith.constant 0 : index
    %0 = vector.load %arg0[%c0, %c0_0] : memref<288x256xf32, #tpu.memory_space<vmem>>, vector<288x256xf32>
    %c0_1 = arith.constant 0 : index
    %c0_2 = arith.constant 0 : index
    %1 = vector.load %arg1[%c0_1, %c0_2] : memref<256x32xf32, #tpu.memory_space<vmem>>, vector<256x32xf32>
    %cst = arith.constant dense<0.000000e+00> : vector<288x32xf32>
    %2 = tpu.matmul %0, %1, %cst {dimension_numbers = #tpu.dot_dimension_numbers<[1], [0], [0], [1], [0, 0, 1, 1], [], []>} : vector<288x256xf32>, vector<256x32xf32>, vector<288x32xf32> -> vector<288x32xf32>
    %c0_3 = arith.constant 0 : index
    %c0_4 = arith.constant 0 : index
    %3 = vector.load %arg2[%c0_3, %c0_4] : memref<1x32xf32, #tpu.memory_space<vmem>>, vector<1x32xf32>
    %4 = vector.broadcast %3 : vector<1x32xf32> to vector<288x32xf32>
    %5 = arith.addf %2, %4 : vector<288x32xf32>
    %cst_5 = arith.constant 0.000000e+00 : f32
    %6 = vector.broadcast %cst_5 : f32 to vector<288x32xf32>
    %7 = arith.maximumf %5, %6 : vector<288x32xf32>
    %c0_6 = arith.constant 0 : index
    %c0_7 = arith.constant 0 : index
    %8 = vector.load %arg12[%c0_6, %c0_7] : memref<288x32xf32, #tpu.memory_space<vmem>>, vector<288x32xf32>
    tpu.vector_store %arg12[%c0_6, %c0_7], %7 {strides = array<i32>} : memref<288x32xf32, #tpu.memory_space<vmem>>, vector<288x32xf32>,
    %c0_8 = arith.constant 0 : index
    %c0_9 = arith.constant 0 : index
    %9 = vector.load %arg12[%c0_8, %c0_9] : memref<288x32xf32, #tpu.memory_space<vmem>>, vector<18x32xf32>
    %c0_10 = arith.constant 0 : index
    %c0_11 = arith.constant 0 : index
    %10 = vector.load %arg13[%c0_10, %c0_11] : memref<18x512xf32, #tpu.memory_space<vmem>>, vector<18x32xf32>
    tpu.vector_store %arg13[%c0_10, %c0_11], %9 {strides = array<i32>} : memref<18x512xf32, #tpu.memory_space<vmem>>, vector<18x32xf32>,
    %c18 = arith.constant 18 : index
    %c0_12 = arith.constant 0 : index
    %11 = vector.load %arg12[%c18, %c0_12] : memref<288x32xf32, #tpu.memory_space<vmem>>, vector<18x32xf32>
    %c0_13 = arith.constant 0 : index
    %c32 = arith.constant 32 : index
    %12 = vector.load %arg13[%c0_13, %c32] : memref<18x512xf32, #tpu.memory_space<vmem>>, vector<18x32xf32>
    tpu.vector_store %arg13[%c0_13, %c32], %11 {strides = array<i32>} : memref<18x512xf32, #tpu.memory_space<vmem>>, vector<18x32xf32>,
    %c36 = arith.constant 36 : index
    %c0_14 = arith.constant 0 : index
    %13 = vector.load %arg12[%c36, %c0_14] : memref<288x32xf32, #tpu.memory_space<vmem>>, vector<18x32xf32>
    %c0_15 = arith.constant 0 : index
    %c64 = arith.constant 64 : index
    %14 = vector.load %arg13[%c0_15, %c64] : memref<18x512xf32, #tpu.memory_space<vmem>>, vector<18x32xf32>
    tpu.vector_store %arg13[%c0_15, %c64], %13 {strides = array<i32>} : memref<18x512xf32, #tpu.memory_space<vmem>>, vector<18x32xf32>,
    %c54 = arith.constant 54 : index
    %c0_16 = arith.constant 0 : index
    %15 = vector.load %arg12[%c54, %c0_16] : memref<288x32xf32, #tpu.memory_space<vmem>>, vector<18x32xf32>
    %c0_17 = arith.constant 0 : index
    %c96 = arith.constant 96 : index
    %16 = vector.load %arg13[%c0_17, %c96] : memref<18x512xf32, #tpu.memory_space<vmem>>, vector<18x32xf32>
    tpu.vector_store %arg13[%c0_17, %c96], %15 {strides = array<i32>} : memref<18x512xf32, #tpu.memory_space<vmem>>, vector<18x32xf32>,
    %c72 = arith.constant 72 : index
    %c0_18 = arith.constant 0 : index
    %17 = vector.load %arg12[%c72, %c0_18] : memref<288x32xf32, #tpu.memory_space<vmem>>, vector<18x32xf32>
    %c0_19 = arith.constant 0 : index
    %c128 = arith.constant 128 : index
    %18 = vector.load %arg13[%c0_19, %c128] : memref<18x512xf32, #tpu.memory_space<vmem>>, vector<18x32xf32>
    tpu.vector_store %arg13[%c0_19, %c128], %17 {strides = array<i32>} : memref<18x512xf32, #tpu.memory_space<vmem>>, vector<18x32xf32>,
    %c90 = arith.constant 90 : index
    %c0_20 = arith.constant 0 : index
    %19 = vector.load %arg12[%c90, %c0_20] : memref<288x32xf32, #tpu.memory_space<vmem>>, vector<18x32xf32>
    %c0_21 = arith.constant 0 : index
    %c160 = arith.constant 160 : index
    %20 = vector.load %arg13[%c0_21, %c160] : memref<18x512xf32, #tpu.memory_space<vmem>>, vector<18x32xf32>
    tpu.vector_store %arg13[%c0_21, %c160], %19 {strides = array<i32>} : memref<18x512xf32, #tpu.memory_space<vmem>>, vector<18x32xf32>,
    %c108 = arith.constant 108 : index
    %c0_22 = arith.constant 0 : index
    %21 = vector.load %arg12[%c108, %c0_22] : memref<288x32xf32, #tpu.memory_space<vmem>>, vector<18x32xf32>
    %c0_23 = arith.constant 0 : index
    %c192 = arith.constant 192 : index
    %22 = vector.load %arg13[%c0_23, %c192] : memref<18x512xf32, #tpu.memory_space<vmem>>, vector<18x32xf32>
    tpu.vector_store %arg13[%c0_23, %c192], %21 {strides = array<i32>} : memref<18x512xf32, #tpu.memory_space<vmem>>, vector<18x32xf32>,
    %c126 = arith.constant 126 : index
    %c0_24 = arith.constant 0 : index
    %23 = vector.load %arg12[%c126, %c0_24] : memref<288x32xf32, #tpu.memory_space<vmem>>, vector<18x32xf32>
    %c0_25 = arith.constant 0 : index
    %c224 = arith.constant 224 : index
    %24 = vector.load %arg13[%c0_25, %c224] : memref<18x512xf32, #tpu.memory_space<vmem>>, vector<18x32xf32>
    tpu.vector_store %arg13[%c0_25, %c224], %23 {strides = array<i32>} : memref<18x512xf32, #tpu.memory_space<vmem>>, vector<18x32xf32>,
    %c144 = arith.constant 144 : index
    %c0_26 = arith.constant 0 : index
    %25 = vector.load %arg12[%c144, %c0_26] : memref<288x32xf32, #tpu.memory_space<vmem>>, vector<18x32xf32>
    %c0_27 = arith.constant 0 : index
    %c256 = arith.constant 256 : index
    %26 = vector.load %arg13[%c0_27, %c256] : memref<18x512xf32, #tpu.memory_space<vmem>>, vector<18x32xf32>
    tpu.vector_store %arg13[%c0_27, %c256], %25 {strides = array<i32>} : memref<18x512xf32, #tpu.memory_space<vmem>>, vector<18x32xf32>,
    %c162 = arith.constant 162 : index
    %c0_28 = arith.constant 0 : index
    %27 = vector.load %arg12[%c162, %c0_28] : memref<288x32xf32, #tpu.memory_space<vmem>>, vector<18x32xf32>
    %c0_29 = arith.constant 0 : index
    %c288 = arith.constant 288 : index
    %28 = vector.load %arg13[%c0_29, %c288] : memref<18x512xf32, #tpu.memory_space<vmem>>, vector<18x32xf32>
    tpu.vector_store %arg13[%c0_29, %c288], %27 {strides = array<i32>} : memref<18x512xf32, #tpu.memory_space<vmem>>, vector<18x32xf32>,
    %c180 = arith.constant 180 : index
    %c0_30 = arith.constant 0 : index
    %29 = vector.load %arg12[%c180, %c0_30] : memref<288x32xf32, #tpu.memory_space<vmem>>, vector<18x32xf32>
    %c0_31 = arith.constant 0 : index
    %c320 = arith.constant 320 : index
    %30 = vector.load %arg13[%c0_31, %c320] : memref<18x512xf32, #tpu.memory_space<vmem>>, vector<18x32xf32>
    tpu.vector_store %arg13[%c0_31, %c320], %29 {strides = array<i32>} : memref<18x512xf32, #tpu.memory_space<vmem>>, vector<18x32xf32>,
    %c198 = arith.constant 198 : index
    %c0_32 = arith.constant 0 : index
    %31 = vector.load %arg12[%c198, %c0_32] : memref<288x32xf32, #tpu.memory_space<vmem>>, vector<18x32xf32>
    %c0_33 = arith.constant 0 : index
    %c352 = arith.constant 352 : index
    %32 = vector.load %arg13[%c0_33, %c352] : memref<18x512xf32, #tpu.memory_space<vmem>>, vector<18x32xf32>
    tpu.vector_store %arg13[%c0_33, %c352], %31 {strides = array<i32>} : memref<18x512xf32, #tpu.memory_space<vmem>>, vector<18x32xf32>,
    %c216 = arith.constant 216 : index
    %c0_34 = arith.constant 0 : index
    %33 = vector.load %arg12[%c216, %c0_34] : memref<288x32xf32, #tpu.memory_space<vmem>>, vector<18x32xf32>
    %c0_35 = arith.constant 0 : index
    %c384 = arith.constant 384 : index
    %34 = vector.load %arg13[%c0_35, %c384] : memref<18x512xf32, #tpu.memory_space<vmem>>, vector<18x32xf32>
    tpu.vector_store %arg13[%c0_35, %c384], %33 {strides = array<i32>} : memref<18x512xf32, #tpu.memory_space<vmem>>, vector<18x32xf32>,
    %c234 = arith.constant 234 : index
    %c0_36 = arith.constant 0 : index
    %35 = vector.load %arg12[%c234, %c0_36] : memref<288x32xf32, #tpu.memory_space<vmem>>, vector<18x32xf32>
    %c0_37 = arith.constant 0 : index
    %c416 = arith.constant 416 : index
    %36 = vector.load %arg13[%c0_37, %c416] : memref<18x512xf32, #tpu.memory_space<vmem>>, vector<18x32xf32>
    tpu.vector_store %arg13[%c0_37, %c416], %35 {strides = array<i32>} : memref<18x512xf32, #tpu.memory_space<vmem>>, vector<18x32xf32>,
    %c252 = arith.constant 252 : index
    %c0_38 = arith.constant 0 : index
    %37 = vector.load %arg12[%c252, %c0_38] : memref<288x32xf32, #tpu.memory_space<vmem>>, vector<18x32xf32>
    %c0_39 = arith.constant 0 : index
    %c448 = arith.constant 448 : index
    %38 = vector.load %arg13[%c0_39, %c448] : memref<18x512xf32, #tpu.memory_space<vmem>>, vector<18x32xf32>
    tpu.vector_store %arg13[%c0_39, %c448], %37 {strides = array<i32>} : memref<18x512xf32, #tpu.memory_space<vmem>>, vector<18x32xf32>,
    %c270 = arith.constant 270 : index
    %c0_40 = arith.constant 0 : index
    %39 = vector.load %arg12[%c270, %c0_40] : memref<288x32xf32, #tpu.memory_space<vmem>>, vector<18x32xf32>
    %c0_41 = arith.constant 0 : index
    %c480 = arith.constant 480 : index
    %40 = vector.load %arg13[%c0_41, %c480] : memref<18x512xf32, #tpu.memory_space<vmem>>, vector<18x32xf32>
    tpu.vector_store %arg13[%c0_41, %c480], %39 {strides = array<i32>} : memref<18x512xf32, #tpu.memory_space<vmem>>, vector<18x32xf32>,
    %c0_42 = arith.constant 0 : index
    %c0_43 = arith.constant 0 : index
    %41 = vector.load %arg13[%c0_42, %c0_43] : memref<18x512xf32, #tpu.memory_space<vmem>>, vector<18x512xf32>
    %c0_44 = arith.constant 0 : index
    %c0_45 = arith.constant 0 : index
    %42 = vector.load %arg3[%c0_44, %c0_45] : memref<512x64xf32, #tpu.memory_space<vmem>>, vector<512x64xf32>
    %cst_46 = arith.constant dense<0.000000e+00> : vector<18x64xf32>
    %43 = tpu.matmul %41, %42, %cst_46 {dimension_numbers = #tpu.dot_dimension_numbers<[1], [0], [0], [1], [0, 0, 1, 1], [], []>} : vector<18x512xf32>, vector<512x64xf32>, vector<18x64xf32> -> vector<18x64xf32>
    %c0_47 = arith.constant 0 : index
    %c0_48 = arith.constant 0 : index
    %44 = vector.load %arg4[%c0_47, %c0_48] : memref<1x64xf32, #tpu.memory_space<vmem>>, vector<1x64xf32>
    %45 = vector.broadcast %44 : vector<1x64xf32> to vector<18x64xf32>
    %46 = arith.addf %43, %45 : vector<18x64xf32>
    %cst_49 = arith.constant 0.000000e+00 : f32
    %47 = vector.broadcast %cst_49 : f32 to vector<18x64xf32>
    %48 = arith.maximumf %46, %47 : vector<18x64xf32>
    %c0_50 = arith.constant 0 : index
    %c0_51 = arith.constant 0 : index
    %49 = vector.load %arg14[%c0_50, %c0_51] : memref<18x64xf32, #tpu.memory_space<vmem>>, vector<18x64xf32>
    tpu.vector_store %arg14[%c0_50, %c0_51], %48 {strides = array<i32>} : memref<18x64xf32, #tpu.memory_space<vmem>>, vector<18x64xf32>,
    %c0_52 = arith.constant 0 : index
    %c0_53 = arith.constant 0 : index
    %50 = vector.load %arg14[%c0_52, %c0_53] : memref<18x64xf32, #tpu.memory_space<vmem>>, vector<2x64xf32>
    %c0_54 = arith.constant 0 : index
    %c0_55 = arith.constant 0 : index
    %51 = vector.load %arg15[%c0_54, %c0_55] : memref<2x576xf32, #tpu.memory_space<vmem>>, vector<2x64xf32>
    tpu.vector_store %arg15[%c0_54, %c0_55], %50 {strides = array<i32>} : memref<2x576xf32, #tpu.memory_space<vmem>>, vector<2x64xf32>,
    %c2 = arith.constant 2 : index
    %c0_56 = arith.constant 0 : index
    %52 = vector.load %arg14[%c2, %c0_56] : memref<18x64xf32, #tpu.memory_space<vmem>>, vector<2x64xf32>
    %c0_57 = arith.constant 0 : index
    %c64_58 = arith.constant 64 : index
    %53 = vector.load %arg15[%c0_57, %c64_58] : memref<2x576xf32, #tpu.memory_space<vmem>>, vector<2x64xf32>
    tpu.vector_store %arg15[%c0_57, %c64_58], %52 {strides = array<i32>} : memref<2x576xf32, #tpu.memory_space<vmem>>, vector<2x64xf32>,
    %c4 = arith.constant 4 : index
    %c0_59 = arith.constant 0 : index
    %54 = vector.load %arg14[%c4, %c0_59] : memref<18x64xf32, #tpu.memory_space<vmem>>, vector<2x64xf32>
    %c0_60 = arith.constant 0 : index
    %c128_61 = arith.constant 128 : index
    %55 = vector.load %arg15[%c0_60, %c128_61] : memref<2x576xf32, #tpu.memory_space<vmem>>, vector<2x64xf32>
    tpu.vector_store %arg15[%c0_60, %c128_61], %54 {strides = array<i32>} : memref<2x576xf32, #tpu.memory_space<vmem>>, vector<2x64xf32>,
    %c6 = arith.constant 6 : index
    %c0_62 = arith.constant 0 : index
    %56 = vector.load %arg14[%c6, %c0_62] : memref<18x64xf32, #tpu.memory_space<vmem>>, vector<2x64xf32>
    %c0_63 = arith.constant 0 : index
    %c192_64 = arith.constant 192 : index
    %57 = vector.load %arg15[%c0_63, %c192_64] : memref<2x576xf32, #tpu.memory_space<vmem>>, vector<2x64xf32>
    tpu.vector_store %arg15[%c0_63, %c192_64], %56 {strides = array<i32>} : memref<2x576xf32, #tpu.memory_space<vmem>>, vector<2x64xf32>,
    %c8 = arith.constant 8 : index
    %c0_65 = arith.constant 0 : index
    %58 = vector.load %arg14[%c8, %c0_65] : memref<18x64xf32, #tpu.memory_space<vmem>>, vector<2x64xf32>
    %c0_66 = arith.constant 0 : index
    %c256_67 = arith.constant 256 : index
    %59 = vector.load %arg15[%c0_66, %c256_67] : memref<2x576xf32, #tpu.memory_space<vmem>>, vector<2x64xf32>
    tpu.vector_store %arg15[%c0_66, %c256_67], %58 {strides = array<i32>} : memref<2x576xf32, #tpu.memory_space<vmem>>, vector<2x64xf32>,
    %c10 = arith.constant 10 : index
    %c0_68 = arith.constant 0 : index
    %60 = vector.load %arg14[%c10, %c0_68] : memref<18x64xf32, #tpu.memory_space<vmem>>, vector<2x64xf32>
    %c0_69 = arith.constant 0 : index
    %c320_70 = arith.constant 320 : index
    %61 = vector.load %arg15[%c0_69, %c320_70] : memref<2x576xf32, #tpu.memory_space<vmem>>, vector<2x64xf32>
    tpu.vector_store %arg15[%c0_69, %c320_70], %60 {strides = array<i32>} : memref<2x576xf32, #tpu.memory_space<vmem>>, vector<2x64xf32>,
    %c12 = arith.constant 12 : index
    %c0_71 = arith.constant 0 : index
    %62 = vector.load %arg14[%c12, %c0_71] : memref<18x64xf32, #tpu.memory_space<vmem>>, vector<2x64xf32>
    %c0_72 = arith.constant 0 : index
    %c384_73 = arith.constant 384 : index
    %63 = vector.load %arg15[%c0_72, %c384_73] : memref<2x576xf32, #tpu.memory_space<vmem>>, vector<2x64xf32>
    tpu.vector_store %arg15[%c0_72, %c384_73], %62 {strides = array<i32>} : memref<2x576xf32, #tpu.memory_space<vmem>>, vector<2x64xf32>,
    %c14 = arith.constant 14 : index
    %c0_74 = arith.constant 0 : index
    %64 = vector.load %arg14[%c14, %c0_74] : memref<18x64xf32, #tpu.memory_space<vmem>>, vector<2x64xf32>
    %c0_75 = arith.constant 0 : index
    %c448_76 = arith.constant 448 : index
    %65 = vector.load %arg15[%c0_75, %c448_76] : memref<2x576xf32, #tpu.memory_space<vmem>>, vector<2x64xf32>
    tpu.vector_store %arg15[%c0_75, %c448_76], %64 {strides = array<i32>} : memref<2x576xf32, #tpu.memory_space<vmem>>, vector<2x64xf32>,
    %c16 = arith.constant 16 : index
    %c0_77 = arith.constant 0 : index
    %66 = vector.load %arg14[%c16, %c0_77] : memref<18x64xf32, #tpu.memory_space<vmem>>, vector<2x64xf32>
    %c0_78 = arith.constant 0 : index
    %c512 = arith.constant 512 : index
    %67 = vector.load %arg15[%c0_78, %c512] : memref<2x576xf32, #tpu.memory_space<vmem>>, vector<2x64xf32>
    tpu.vector_store %arg15[%c0_78, %c512], %66 {strides = array<i32>} : memref<2x576xf32, #tpu.memory_space<vmem>>, vector<2x64xf32>,
    %c0_79 = arith.constant 0 : index
    %c0_80 = arith.constant 0 : index
    %68 = vector.load %arg15[%c0_79, %c0_80] : memref<2x576xf32, #tpu.memory_space<vmem>>, vector<2x576xf32>
    %c0_81 = arith.constant 0 : index
    %c0_82 = arith.constant 0 : index
    %69 = vector.load %arg5[%c0_81, %c0_82] : memref<576x64xf32, #tpu.memory_space<vmem>>, vector<576x64xf32>
    %cst_83 = arith.constant dense<0.000000e+00> : vector<2x64xf32>
    %70 = tpu.matmul %68, %69, %cst_83 {dimension_numbers = #tpu.dot_dimension_numbers<[1], [0], [0], [1], [0, 0, 1, 1], [], []>} : vector<2x576xf32>, vector<576x64xf32>, vector<2x64xf32> -> vector<2x64xf32>
    %c0_84 = arith.constant 0 : index
    %c0_85 = arith.constant 0 : index
    %71 = vector.load %arg6[%c0_84, %c0_85] : memref<1x64xf32, #tpu.memory_space<vmem>>, vector<1x64xf32>
    %72 = vector.broadcast %71 : vector<1x64xf32> to vector<2x64xf32>
    %73 = arith.addf %70, %72 : vector<2x64xf32>
    %cst_86 = arith.constant 0.000000e+00 : f32
    %74 = vector.broadcast %cst_86 : f32 to vector<2x64xf32>
    %75 = arith.maximumf %73, %74 : vector<2x64xf32>
    %c0_87 = arith.constant 0 : index
    %c0_88 = arith.constant 0 : index
    %76 = vector.load %arg7[%c0_87, %c0_88] : memref<64x256xf32, #tpu.memory_space<vmem>>, vector<64x256xf32>
    %cst_89 = arith.constant dense<0.000000e+00> : vector<2x256xf32>
    %77 = tpu.matmul %75, %76, %cst_89 {dimension_numbers = #tpu.dot_dimension_numbers<[1], [0], [0], [1], [0, 0, 1, 1], [], []>} : vector<2x64xf32>, vector<64x256xf32>, vector<2x256xf32> -> vector<2x256xf32>
    %c0_90 = arith.constant 0 : index
    %c0_91 = arith.constant 0 : index
    %78 = vector.load %arg8[%c0_90, %c0_91] : memref<1x256xf32, #tpu.memory_space<vmem>>, vector<1x256xf32>
    %79 = vector.broadcast %78 : vector<1x256xf32> to vector<2x256xf32>
    %80 = arith.addf %77, %79 : vector<2x256xf32>
    %cst_92 = arith.constant 0.000000e+00 : f32
    %81 = vector.broadcast %cst_92 : f32 to vector<2x256xf32>
    %82 = arith.cmpf ogt, %80, %81 : vector<2x256xf32>
    %cst_93 = arith.constant 0.00999999977 : f32
    %83 = vector.broadcast %cst_93 : f32 to vector<2x256xf32>
    %84 = arith.mulf %83, %80 : vector<2x256xf32>
    %85 = arith.select %82, %80, %84 : vector<2x256xi1>, vector<2x256xf32>
    %c0_94 = arith.constant 0 : index
    %c0_95 = arith.constant 0 : index
    %86 = vector.load %arg9[%c0_94, %c0_95] : memref<256x7xf32, #tpu.memory_space<vmem>>, vector<256x7xf32>
    %cst_96 = arith.constant dense<0.000000e+00> : vector<2x7xf32>
    %87 = tpu.matmul %85, %86, %cst_96 {dimension_numbers = #tpu.dot_dimension_numbers<[1], [0], [0], [1], [0, 0, 1, 1], [], []>} : vector<2x256xf32>, vector<256x7xf32>, vector<2x7xf32> -> vector<2x7xf32>
    %c0_97 = arith.constant 0 : index
    %c0_98 = arith.constant 0 : index
    %88 = vector.load %arg10[%c0_97, %c0_98] : memref<1x7xf32, #tpu.memory_space<vmem>>, vector<1x7xf32>
    %89 = vector.broadcast %88 : vector<1x7xf32> to vector<2x7xf32>
    %90 = arith.addf %87, %89 : vector<2x7xf32>
    %91 = vector.extract_strided_slice %90 {offsets = [0, 0], sizes = [2, 6], strides = [1, 1]} : vector<2x7xf32> to vector<2x6xf32>
    %92 = vector.extract_strided_slice %90 {offsets = [0, 6], sizes = [2, 1], strides = [1, 1]} : vector<2x7xf32> to vector<2x1xf32>
    %93 = vector.shape_cast %91 : vector<2x6xf32> to vector<1x2x6xf32>
    %cst_99 = arith.constant dense<0.000000e+00> : vector<1xf32>
    %94 = vector.multi_reduction <add>, %93, %cst_99 [1, 2] : vector<1x2x6xf32> to vector<1xf32>
    %95 = vector.shape_cast %94 : vector<1xf32> to vector<1x1x1xf32>
    %96 = vector.extract %95[0, 0, 0] : f32 from vector<1x1x1xf32>
    %cst_100 = arith.constant 1.200000e+01 : f32
    %97 = arith.divf %96, %cst_100 : f32
    %98 = vector.broadcast %97 : f32 to vector<2x6xf32>
    %99 = arith.subf %91, %98 : vector<2x6xf32>
    %100 = vector.broadcast %92 : vector<2x1xf32> to vector<2x6xf32>
    %101 = arith.addf %100, %99 : vector<2x6xf32>
    %c0_101 = arith.constant 0 : index
    %c0_102 = arith.constant 0 : index
    %102 = vector.load %arg11[%c0_101, %c0_102] : memref<2x6xf32, #tpu.memory_space<vmem>>, vector<2x6xf32>
    tpu.vector_store %arg11[%c0_101, %c0_102], %101 {strides = array<i32>} : memref<2x6xf32, #tpu.memory_space<vmem>>, vector<2x6xf32>,
    return
  }
}

</mosaic_0001>

<bundles_post_ra>
// kernel: duelcnn_forward.1
= control target key start
LH: loop header
LB: loop body
LE: loop exit
PB: predicated region body
PF: predicated region fallthrough
CT: control target
= control target key end

     0   :  { %s2549_s0 = inlined_call_operand.vmem [shape: f32[288,256], index: 0, kind: input, shape index: {}]   ;;  %s2550_s1 = inlined_call_operand.vmem [shape: f32[256,32], index: 1, kind: input, shape index: {}]   ;;  %s2551_s2 = inlined_call_operand.vmem [shape: f32[1,32], index: 2, kind: input, shape index: {}]   ;;  %s2552_s3 = inlined_call_operand.vmem [shape: f32[512,64], index: 3, kind: input, shape index: {}]   ;;  %s2553_s4 = inlined_call_operand.vmem [shape: f32[1,64], index: 4, kind: input, shape index: {}]   ;;  %s2554_s5 = inlined_call_operand.vmem [shape: f32[576,64], index: 5, kind: input, shape index: {}]   ;;  %s2555_s6 = inlined_call_operand.vmem [shape: f32[1,64], index: 6, kind: input, shape index: {}]   ;;  %s2556_s7 = inlined_call_operand.vmem [shape: f32[64,256], index: 7, kind: input, shape index: {}]   ;;  %s2557_s8 = inlined_call_operand.vmem [shape: f32[1,256], index: 8, kind: input, shape index: {}]   ;;  %s2558_s9 = inlined_call_operand.vmem [shape: f32[256,7], index: 9, kind: input, shape index: {}]   ;;  %s2559_s10 = inlined_call_operand.vmem [shape: f32[1,7], index: 10, kind: input, shape index: {}]   ;;  %s2560_s11 = inlined_call_operand.hbm [shape: f32[2,6], index: 11, kind: output, shape index: {}]  }
   0x1   :  { %v126_v0 = vld [vmem:[%s2550_s1 + $0x78] sm:$0xff]  ;;  %v125_v1 = vld [vmem:[%s2550_s1 + $0x70] sm:$0xff]  ;;  %v124_v4 = vld [vmem:[%s2550_s1 + $0x68] sm:$0xff] }
   0x2   :  { %v142_v2 = vld [vmem:[%s2550_s1 + $0xf8] sm:$0xff]  ;;  %147 = vmatpush.msra.mxu0 %v126_v0  ;;  %1334 = vmatpush.msra.mxu3 %v126_v0  ;;  %v141_v3 = vld [vmem:[%s2550_s1 + $0xf0] sm:$0xff]  ;;  %v140_v5 = vld [vmem:[%s2550_s1 + $0xe8] sm:$0xff] }
   0x3   :  { %272 = vmatpush.msra.mxu1 %v142_v2  ;;  %1350 = vmatpush.msra.mxu2 %v142_v2  ;;  %v123_v6 = vld [vmem:[%s2550_s1 + $0x60] sm:$0xff]  ;;  %v122_v8 = vld [vmem:[%s2550_s1 + $0x58] sm:$0xff]  ;;  %v121_v10 = vld [vmem:[%s2550_s1 + $0x50] sm:$0xff] }
   0x4   :  { %148 = vmatpush.msra.mxu0 %v125_v1  ;;  %1335 = vmatpush.msra.mxu3 %v125_v1  ;;  %v139_v7 = vld [vmem:[%s2550_s1 + $0xe0] sm:$0xff]  ;;  %v138_v9 = vld [vmem:[%s2550_s1 + $0xd8] sm:$0xff]  ;;  %v137_v11 = vld [vmem:[%s2550_s1 + $0xd0] sm:$0xff] }
   0x5   :  { %273 = vmatpush.msra.mxu1 %v141_v3  ;;  %1351 = vmatpush.msra.mxu2 %v141_v3  ;;  %v120_v12 = vld [vmem:[%s2550_s1 + $0x48] sm:$0xff]  ;;  %v119_v14 = vld [vmem:[%s2550_s1 + $0x40] sm:$0xff]  ;;  %v118_v15 = vld [vmem:[%s2550_s1 + $0x38] sm:$0xff] }
   0x6   :  { %149 = vmatpush.msra.mxu0 %v124_v4  ;;  %1336 = vmatpush.msra.mxu3 %v124_v4  ;;  %v136_v13 = vld [vmem:[%s2550_s1 + $0xc8] sm:$0xff]  ;;  %v135_v16 = vld [vmem:[%s2550_s1 + $0xc0] sm:$0xff]  ;;  %v134_v17 = vld [vmem:[%s2550_s1 + $0xb8] sm:$0xff] }
   0x7   :  { %274 = vmatpush.msra.mxu1 %v140_v5  ;;  %1352 = vmatpush.msra.mxu2 %v140_v5 }
   0x8   :  { %150 = vmatpush.msra.mxu0 %v123_v6  ;;  %1337 = vmatpush.msra.mxu3 %v123_v6 }
   0x9   :  { %275 = vmatpush.msra.mxu1 %v139_v7  ;;  %1353 = vmatpush.msra.mxu2 %v139_v7 }
   0xa   :  { %151 = vmatpush.msra.mxu0 %v122_v8  ;;  %1338 = vmatpush.msra.mxu3 %v122_v8 }
   0xb   :  { %276 = vmatpush.msra.mxu1 %v138_v9  ;;  %1354 = vmatpush.msra.mxu2 %v138_v9 }
   0xc   :  { %152 = vmatpush.msra.mxu0 %v121_v10  ;;  %1339 = vmatpush.msra.mxu3 %v121_v10 }
   0xd   :  { %277 = vmatpush.msra.mxu1 %v137_v11  ;;  %1355 = vmatpush.msra.mxu2 %v137_v11 }
   0xe   :  { %153 = vmatpush.msra.mxu0 %v120_v12  ;;  %1340 = vmatpush.msra.mxu3 %v120_v12 }
   0xf   :  { %278 = vmatpush.msra.mxu1 %v136_v13  ;;  %1356 = vmatpush.msra.mxu2 %v136_v13 }
  0x10   :  { %154 = vmatpush.msra.mxu0 %v119_v14  ;;  %1341 = vmatpush.msra.mxu3 %v119_v14 }
  0x11   :  { %16 = vsyncpa [#allocation7], 0  ;;  %279 = vmatpush.msra.mxu1 %v135_v16  ;;  %1357 = vmatpush.msra.mxu2 %v135_v16  ;;  %v117_v18 = vld [vmem:[%s2550_s1 + $0x30] sm:$0xff]  ;;  %v116_v20 = vld [vmem:[%s2550_s1 + $0x28] sm:$0xff]  ;;  %vm433_vm0 = vcmask 261120   ;;  %vm475_vm1 = vcmask 254976  }
  0x12   :  { %155 = vmatpush.msra.mxu0 %v118_v15  ;;  %1342 = vmatpush.msra.mxu3 %v118_v15  ;;  %v133_v19 = vld [vmem:[%s2550_s1 + $0xb0] sm:$0xff]  ;;  %v132_v21 = vld [vmem:[%s2550_s1 + $0xa8] sm:$0xff]  ;;  %v115_v22 = vld [vmem:[%s2550_s1 + $0x20] sm:$0xff]  ;;  %s1410_s21 = smov 32   ;;  %s1411_s29 = smov 64   ;;  %vm492_vm2 = vcmask 523520  }
  0x13   :  { %280 = vmatpush.msra.mxu1 %v134_v17  ;;  %1358 = vmatpush.msra.mxu2 %v134_v17  ;;  %v131_v23 = vld [vmem:[%s2550_s1 + $0xa0] sm:$0xff]  ;;  %v114_v24 = vld [vmem:[%s2550_s1 + $0x18] sm:$0xff]  ;;  %v113_v26 = vld [vmem:[%s2550_s1 + $0x10] sm:$0xff]  ;;  %s1412_s18 = smov 96   ;;  %vm495_vm3 = vcmask 517376   ;;  %vm512_vm4 = vcmask 785920  }
  0x14   :  { %156 = vmatpush.msra.mxu0 %v117_v18  ;;  %1343 = vmatpush.msra.mxu3 %v117_v18  ;;  %v130_v25 = vld [vmem:[%s2550_s1 + $0x98] sm:$0xff]  ;;  %v129_v27 = vld [vmem:[%s2550_s1 + $0x90] sm:$0xff]  ;;  %v112_v28 = vld [vmem:[%s2550_s1 + $0x8] sm:$0xff]  ;;  %vm532_vm5 = vcmask 1048320   ;;  %vm515_vm6 = vcmask 779776   ;;  %vm535_vm7 = vcmask 1042176  }
  0x15   :  { %281 = vmatpush.msra.mxu1 %v133_v19  ;;  %1359 = vmatpush.msra.mxu2 %v133_v19  ;;  %v128_v29 = vld [vmem:[%s2550_s1 + $0x88] sm:$0xff]  ;;  %v111_v30 = vld [vmem:[%s2550_s1] sm:$0xff]  ;;  %v41_v36 = vld [vmem:[%s2549_s0 + $0x10] sm:$0xff]  ;;  %vm904_vm8 = vcmask 523264   ;;  %vm907_vm9 = vcmask 517120   ;;  %vm916_vm10 = vcmask 1041920  }
  0x16   :  { %157 = vmatpush.msra.mxu0 %v116_v20  ;;  %1344 = vmatpush.msra.mxu3 %v116_v20  ;;  %v39_v31 = vld [vmem:[%s2549_s0] sm:$0xff]  ;;  %v40_v34 = vld [vmem:[%s2549_s0 + $0x8] sm:$0xff]  ;;  %v97_v37 = vld [vmem:[%s2549_s0 + $0x1d0] sm:$0xff]  ;;  %vm1286_vm13 = vcmask 41984   ;;  %s1322_s25 = sshll.u32 %s2560_s11, 4  ;;  %s1323_s25 = int_to_ptr.hbm [resolvable:$true] %s1322_s25 }
  0x17   :  { %282 = vmatpush.msra.mxu1 %v132_v21  ;;  %1360 = vmatpush.msra.mxu2 %v132_v21  ;;  %v95_v32 = vld [vmem:[%s2549_s0 + $0x1c0] sm:$0xff]  ;;  %v96_v35 = vld [vmem:[%s2549_s0 + $0x1c8] sm:$0xff]  ;;  %v42_v38 = vld [vmem:[%s2549_s0 + $0x18] sm:$0xff] }
  0x18   :  { %158 = vmatpush.msra.mxu0 %v115_v22  ;;  %1345 = vmatpush.msra.mxu3 %v115_v22  ;;  %v127_v33 = vld [vmem:[%s2550_s1 + $0x80] sm:$0xff]  ;;  %v98_v39 = vld [vmem:[%s2549_s0 + $0x1d8] sm:$0xff]  ;;  %v44_v42 = vld [vmem:[%s2549_s0 + $0x28] sm:$0xff] }
  0x19   :  { %283 = vmatpush.msra.mxu1 %v131_v23  ;;  %1361 = vmatpush.msra.mxu2 %v131_v23  ;;  %v43_v40 = vld [vmem:[%s2549_s0 + $0x20] sm:$0xff]  ;;  %v100_v43 = vld [vmem:[%s2549_s0 + $0x1e8] sm:$0xff]  ;;  %v45_v44 = vld [vmem:[%s2549_s0 + $0x30] sm:$0xff] }
  0x1a   :  { %159 = vmatpush.msra.mxu0 %v114_v24  ;;  %1346 = vmatpush.msra.mxu3 %v114_v24  ;;  %v99_v41 = vld [vmem:[%s2549_s0 + $0x1e0] sm:$0xff]  ;;  %v101_v45 = vld [vmem:[%s2549_s0 + $0x1f0] sm:$0xff]  ;;  %v46_v46 = vld [vmem:[%s2549_s0 + $0x38] sm:$0xff] }
  0x1b   :  { %284 = vmatpush.msra.mxu1 %v130_v25  ;;  %1362 = vmatpush.msra.mxu2 %v130_v25  ;;  %v102_v47 = vld [vmem:[%s2549_s0 + $0x1f8] sm:$0xff]  ;;  %v47_v48 = vld [vmem:[%s2549_s0 + $0x40] sm:$0xff]  ;;  %v48_v50 = vld [vmem:[%s2549_s0 + $0x48] sm:$0xff] }
  0x1c   :  { %160 = vmatpush.msra.mxu0 %v113_v26  ;;  %1347 = vmatpush.msra.mxu3 %v113_v26  ;;  %v103_v49 = vld [vmem:[%s2549_s0 + $0x200] sm:$0xff]  ;;  %v104_v51 = vld [vmem:[%s2549_s0 + $0x208] sm:$0xff]  ;;  %v49_v52 = vld [vmem:[%s2549_s0 + $0x50] sm:$0xff] }
  0x1d   :  { %285 = vmatpush.msra.mxu1 %v129_v27  ;;  %1363 = vmatpush.msra.mxu2 %v129_v27  ;;  %v105_v53 = vld [vmem:[%s2549_s0 + $0x210] sm:$0xff]  ;;  %v50_v54 = vld [vmem:[%s2549_s0 + $0x58] sm:$0xff]  ;;  %v51_v56 = vld [vmem:[%s2549_s0 + $0x60] sm:$0xff] }
  0x1e   :  { %161 = vmatpush.msra.mxu0 %v112_v28  ;;  %1348 = vmatpush.msra.mxu3 %v112_v28  ;;  %v106_v55 = vld [vmem:[%s2549_s0 + $0x218] sm:$0xff]  ;;  %v107_v57 = vld [vmem:[%s2549_s0 + $0x220] sm:$0xff]  ;;  %v52_v58 = vld [vmem:[%s2549_s0 + $0x68] sm:$0xff] }
  0x1f   :  { %286 = vmatpush.msra.mxu1 %v128_v29  ;;  %1364 = vmatpush.msra.mxu2 %v128_v29  ;;  %v108_v59 = vld [vmem:[%s2549_s0 + $0x228] sm:$0xff]  ;;  %v53_v60 = vld [vmem:[%s2549_s0 + $0x70] sm:$0xff]  ;;  %v54_v61 = vld [vmem:[%s2549_s0 + $0x78] sm:$0xff] }
  0x20   :  { %162 = vmatpush.msra.mxu0 %v111_v30  ;;  %1349 = vmatpush.msra.mxu3 %v111_v30  ;;  %v55_v62 = vld [vmem:[%s2549_s0 + $0x80] sm:$0xff]  ;;  %v56_v63 = vld [vmem:[%s2549_s0 + $0x88] sm:$0xff]  ;;  %v57_v0 = vld [vmem:[%s2549_s0 + $0x90] sm:$0xff] }
  0x21   :  { %163 = vmatmul.f32.vlgmr.msra.gmra.mxu0 %v39_v31  ;;  %247 = vmatmul.f32.vlgmr.msra.gmra.mxu3 %v95_v32  ;;  %v58_v1 = vld [vmem:[%s2549_s0 + $0x98] sm:$0xff]  ;;  %v59_v2 = vld [vmem:[%s2549_s0 + $0xa0] sm:$0xff]  ;;  %v60_v3 = vld [vmem:[%s2549_s0 + $0xa8] sm:$0xff] }
  0x22   :  { %287 = vmatpush.msra.mxu1 %v127_v33  ;;  %1365 = vmatpush.msra.mxu2 %v127_v33  ;;  %v61_v4 = vld [vmem:[%s2549_s0 + $0xb0] sm:$0xff]  ;;  %v62_v5 = vld [vmem:[%s2549_s0 + $0xb8] sm:$0xff]  ;;  %v63_v6 = vld [vmem:[%s2549_s0 + $0xc0] sm:$0xff] }
  0x23   :  { %288 = vmatmul.f32.vlgmr.msra.gmra.mxu1 %v40_v34  ;;  %372 = vmatmul.f32.vlgmr.msra.gmra.mxu2 %v96_v35  ;;  %v64_v7 = vld [vmem:[%s2549_s0 + $0xc8] sm:$0xff]  ;;  %v65_v8 = vld [vmem:[%s2549_s0 + $0xd0] sm:$0xff]  ;;  %v66_v9 = vld [vmem:[%s2549_s0 + $0xd8] sm:$0xff] }
  0x24   :  { %v67_v10 = vld [vmem:[%s2549_s0 + $0xe0] sm:$0xff]  ;;  %v68_v11 = vld [vmem:[%s2549_s0 + $0xe8] sm:$0xff]  ;;  %v109_v12 = vld [vmem:[%s2549_s0 + $0x230] sm:$0xff] }
  0x25   :  { %v110_v13 = vld [vmem:[%s2549_s0 + $0x238] sm:$0xff]  ;;  %v69_v14 = vld [vmem:[%s2549_s0 + $0xf0] sm:$0xff]  ;;  %v1719_v16 = vld [vmem:[%s2551_s2] ss:$0 sm:$0xff] }
  0x26   :  { %v70_v15 = vld [vmem:[%s2549_s0 + $0xf8] sm:$0xff]  ;;  %v71_v18 = vld [vmem:[%s2549_s0 + $0x100] sm:$0xff]  ;;  %v72_v21 = vld [vmem:[%s2549_s0 + $0x108] sm:$0xff] }
  0x27   :  { %v73_v28 = vld [vmem:[%s2549_s0 + $0x110] sm:$0xff]  ;;  %v74_v32 = vld [vmem:[%s2549_s0 + $0x118] sm:$0xff] }
  0x29   :  { %166 = vmatmul.f32.gmra.mxu0 %v41_v36  ;;  %250 = vmatmul.f32.gmra.mxu3 %v97_v37 }
  0x2b   :  { %291 = vmatmul.f32.gmra.mxu1 %v42_v38  ;;  %375 = vmatmul.f32.gmra.mxu2 %v98_v39 }
  0x31   :  { %169 = vmatmul.f32.gmra.mxu0 %v43_v40  ;;  %253 = vmatmul.f32.gmra.mxu3 %v99_v41  ;;  %v75_v41 = vld [vmem:[%s2549_s0 + $0x120] sm:$0xff] }
  0x33   :  { %294 = vmatmul.f32.gmra.mxu1 %v44_v42  ;;  %378 = vmatmul.f32.gmra.mxu2 %v100_v43 }
  0x39   :  { %172 = vmatmul.f32.gmra.mxu0 %v45_v44  ;;  %256 = vmatmul.f32.gmra.mxu3 %v101_v45  ;;  %v76_v45 = vld [vmem:[%s2549_s0 + $0x128] sm:$0xff] }
  0x3b   :  { %297 = vmatmul.f32.gmra.mxu1 %v46_v46  ;;  %381 = vmatmul.f32.gmra.mxu2 %v102_v47 }
  0x41   :  { %175 = vmatmul.f32.gmra.mxu0 %v47_v48  ;;  %259 = vmatmul.f32.gmra.mxu3 %v103_v49 }
  0x43   :  { %300 = vmatmul.f32.gmra.mxu1 %v48_v50  ;;  %384 = vmatmul.f32.gmra.mxu2 %v104_v51 }
  0x49   :  { %178 = vmatmul.f32.gmra.mxu0 %v49_v52  ;;  %262 = vmatmul.f32.gmra.mxu3 %v105_v53 }
  0x4b   :  { %303 = vmatmul.f32.gmra.mxu1 %v50_v54  ;;  %387 = vmatmul.f32.gmra.mxu2 %v106_v55  ;;  %v77_v54 = vld [vmem:[%s2549_s0 + $0x130] sm:$0xff] }
  0x51   :  { %181 = vmatmul.f32.gmra.mxu0 %v51_v56  ;;  %265 = vmatmul.f32.gmra.mxu3 %v107_v57 }
  0x53   :  { %306 = vmatmul.f32.gmra.mxu1 %v52_v58  ;;  %390 = vmatmul.f32.gmra.mxu2 %v108_v59  ;;  %v78_v58 = vld [vmem:[%s2549_s0 + $0x138] sm:$0xff] }
  0x59   :  { %184 = vmatmul.f32.gmra.mxu0 %v53_v60  ;;  %268 = vmatmul.f32.gmra.mxu3 %v109_v12 }
  0x5b   :  { %309 = vmatmul.f32.gmra.mxu1 %v54_v61  ;;  %393 = vmatmul.f32.gmra.mxu2 %v110_v13 }
  0x61   :  { %187 = vmatmul.f32.gmra.mxu0 %v55_v62 }
  0x63   :  { %312 = vmatmul.f32.gmra.mxu1 %v56_v63 }
  0x69   :  { %190 = vmatmul.f32.gmra.mxu0 %v57_v0 }
  0x6b   :  { %315 = vmatmul.f32.gmra.mxu1 %v58_v1 }
  0x71   :  { %193 = vmatmul.f32.gmra.mxu0 %v59_v2 }
  0x73   :  { %318 = vmatmul.f32.gmra.mxu1 %v60_v3  ;;  %v79_v3 = vld [vmem:[%s2549_s0 + $0x140] sm:$0xff] }
  0x79   :  { %196 = vmatmul.f32.gmra.mxu0 %v61_v4 }
  0x7b   :  { %321 = vmatmul.f32.gmra.mxu1 %v62_v5 }
  0x81   :  { %199 = vmatmul.f32.gmra.mxu0 %v63_v6 }
  0x83   :  { %324 = vmatmul.f32.gmra.mxu1 %v64_v7  ;;  %v80_v7 = vld [vmem:[%s2549_s0 + $0x148] sm:$0xff] }
  0x89   :  { %202 = vmatmul.f32.gmra.mxu0 %v65_v8 }
  0x8b   :  { %327 = vmatmul.f32.gmra.mxu1 %v66_v9 }
  0x91   :  { %205 = vmatmul.f32.gmra.mxu0 %v67_v10 }
  0x93   :  { %330 = vmatmul.f32.gmra.mxu1 %v68_v11 }
  0x99   :  { %208 = vmatmul.f32.gmra.mxu0 %v69_v14 }
  0x9b   :  { %333 = vmatmul.f32.gmra.mxu1 %v70_v15 }
  0x9e   :  { %v164_v17 = vpop.f32.mrf.mxu0 }
  0x9f   :  { %v165_v19 = vadd.f32 %v1719_v16, %v164_v17  ;;  %v81_v17 = vld [vmem:[%s2549_s0 + $0x150] sm:$0xff] }
  0xa0   :  { %v289_v20 = vpop.f32.mrf.mxu1 }
  0xa1   :  { %v290_v22 = vadd.f32 %v289_v20, %v165_v19  ;;  %211 = vmatmul.f32.gmra.mxu0 %v71_v18 }
  0xa3   :  { %v397_v23 = vmax.f32 %v290_v22, 0.0  ;;  %336 = vmatmul.f32.gmra.mxu1 %v72_v21  ;;  %v82_v21 = vld [vmem:[%s2549_s0 + $0x158] sm:$0xff] }
  0xa4   :  { %v248_v24 = vpop.f32.mrf.mxu3 }
  0xa5   :  { %434 = vst.msk [vmem:[#allocation2] sm:$0xff] %vm433_vm0, %v397_v23  ;;  %v249_v25 = vadd.f32 %v1719_v16, %v248_v24 }
  0xa6   :  { %v167_v26 = vpop.f32.mrf.mxu0  ;;  %v373_v27 = vpop.f32.mrf.mxu2 }
  0xa7   :  { %v168_v29 = vadd.f32 %v1719_v16, %v167_v26  ;;  %v374_v30 = vadd.f32 %v373_v27, %v249_v25 }
  0xa8   :  { %v292_v31 = vpop.f32.mrf.mxu1 }
  0xa9   :  { %v425_v33 = vmax.f32 %v374_v30, 0.0  ;;  %v293_v34 = vadd.f32 %v292_v31, %v168_v29  ;;  %214 = vmatmul.f32.gmra.mxu0 %v73_v28  ;;  %v83_v30 = vld [vmem:[%s2549_s0 + $0x160] sm:$0xff] }
  0xab   :  { %462 = vst.msk [vmem:[#allocation2 + $0xe0] sm:$0xff] %vm433_vm0, %v425_v33  ;;  %v398_v35 = vmax.f32 %v293_v34, 0.0  ;;  %339 = vmatmul.f32.gmra.mxu1 %v74_v32  ;;  %v84_v34 = vld [vmem:[%s2549_s0 + $0x168] sm:$0xff] }
  0xac   :  { %v251_v36 = vpop.f32.mrf.mxu3  ;;  %v470_v37 = vld [vmem:[#allocation2] sm:$0xff] }
  0xad   :  { %435 = vst.msk [vmem:[#allocation2 + $0x8] sm:$0xff] %vm433_vm0, %v398_v35  ;;  %v252_v38 = vadd.f32 %v1719_v16, %v251_v36 }
  0xae   :  { %v170_v39 = vpop.f32.mrf.mxu0  ;;  %v376_v40 = vpop.f32.mrf.mxu2  ;;  %473 = vst.msk [vmem:[#allocation3] sm:$0xff] %vm433_vm0, %v470_v37 }
  0xaf   :  { %v171_v42 = vadd.f32 %v1719_v16, %v170_v39  ;;  %v377_v43 = vadd.f32 %v376_v40, %v252_v38 }
  0xb0   :  { %v295_v44 = vpop.f32.mrf.mxu1 }
  0xb1   :  { %v426_v46 = vmax.f32 %v377_v43, 0.0  ;;  %v296_v47 = vadd.f32 %v295_v44, %v171_v42  ;;  %217 = vmatmul.f32.gmra.mxu0 %v75_v41  ;;  %v85_v44 = vld [vmem:[%s2549_s0 + $0x170] sm:$0xff] }
  0xb3   :  { %463 = vst.msk [vmem:[#allocation2 + $0xe8] sm:$0xff] %vm433_vm0, %v426_v46  ;;  %v399_v48 = vmax.f32 %v296_v47, 0.0  ;;  %342 = vmatmul.f32.gmra.mxu1 %v76_v45 }
  0xb4   :  { %v254_v49 = vpop.f32.mrf.mxu3  ;;  %v471_v50 = vld [vmem:[#allocation2 + $0x8] sm:$0xff] }
  0xb5   :  { %436 = vst.msk [vmem:[#allocation2 + $0x10] sm:$0xff] %vm433_vm0, %v399_v48  ;;  %v255_v51 = vadd.f32 %v1719_v16, %v254_v49  ;;  %v86_v48 = vld [vmem:[%s2549_s0 + $0x178] sm:$0xff] }
  0xb6   :  { %v173_v52 = vpop.f32.mrf.mxu0  ;;  %v379_v53 = vpop.f32.mrf.mxu2  ;;  %474 = vst.msk [vmem:[#allocation3 + $0x20] sm:$0xff] %vm433_vm0, %v471_v50 }
  0xb7   :  { %v174_v55 = vadd.f32 %v1719_v16, %v173_v52  ;;  %v380_v56 = vadd.f32 %v379_v53, %v255_v51 }
  0xb8   :  { %v298_v57 = vpop.f32.mrf.mxu1 }
  0xb9   :  { %v427_v59 = vmax.f32 %v380_v56, 0.0  ;;  %v299_v60 = vadd.f32 %v298_v57, %v174_v55  ;;  %220 = vmatmul.f32.gmra.mxu0 %v77_v54  ;;  %v87_v55 = vld [vmem:[%s2549_s0 + $0x180] sm:$0xff] }
  0xbb   :  { %464 = vst.msk [vmem:[#allocation2 + $0xf0] sm:$0xff] %vm433_vm0, %v427_v59  ;;  %v400_v61 = vmax.f32 %v299_v60, 0.0  ;;  %345 = vmatmul.f32.gmra.mxu1 %v78_v58  ;;  %v88_v58 = vld [vmem:[%s2549_s0 + $0x188] sm:$0xff] }
  0xbc   :  { %v257_v62 = vpop.f32.mrf.mxu3  ;;  %v472_v63 = vld [vmem:[#allocation2 + $0x10] sm:$0x3] }
  0xbd   :  { %437 = vst.msk [vmem:[#allocation2 + $0x18] sm:$0xff] %vm433_vm0, %v400_v61  ;;  %v258_v0 = vadd.f32 %v1719_v16, %v257_v62 }
  0xbe   :  { %v176_v1 = vpop.f32.mrf.mxu0  ;;  %v382_v2 = vpop.f32.mrf.mxu2  ;;  %476 = vst.msk [vmem:[#allocation3 + $0x40] sm:$0x3] %vm475_vm1, %v472_v63 }
  0xbf   :  { %v177_v4 = vadd.f32 %v1719_v16, %v176_v1  ;;  %v383_v5 = vadd.f32 %v382_v2, %v258_v0  ;;  %v89_v1 = vld [vmem:[%s2549_s0 + $0x190] sm:$0xff] }
  0xc0   :  { %v301_v6 = vpop.f32.mrf.mxu1 }
  0xc1   :  { %v302_v8 = vadd.f32 %v301_v6, %v177_v4  ;;  %v428_v9 = vmax.f32 %v383_v5, 0.0  ;;  %223 = vmatmul.f32.gmra.mxu0 %v79_v3  ;;  %v90_v4 = vld [vmem:[%s2549_s0 + $0x198] sm:$0xff] }
  0xc2   :  { %v663_v10 = vld [vmem:[#allocation2 + $0xea] sm:$0xff] }
  0xc3   :  { %v401_v11 = vmax.f32 %v302_v8, 0.0  ;;  %465 = vst.msk [vmem:[#allocation2 + $0xf8] sm:$0xff] %vm433_vm0, %v428_v9  ;;  %669 = vrot.lane.b32.xlu0 %v663_v10, %s1410_s21  ;;  %348 = vmatmul.f32.gmra.mxu1 %v80_v7  ;;  %v91_v10 = vld [vmem:[%s2549_s0 + $0x1a0] sm:$0xff] }
  0xc4   :  { %v260_v12 = vpop.f32.mrf.mxu3  ;;  %v477_v24 = vld [vmem:[#allocation2 + $0x12] sm:$0xff] }
  0xc5   :  { %438 = vst.msk [vmem:[#allocation2 + $0x20] sm:$0xff] %vm433_vm0, %v401_v11  ;;  %v261_v13 = vadd.f32 %v1719_v16, %v260_v12  ;;  %v658_v11 = vld [vmem:[#allocation2 + $0xe0] sm:$0xff] }
  0xc6   :  { %v179_v14 = vpop.f32.mrf.mxu0  ;;  %v385_v15 = vpop.f32.mrf.mxu2  ;;  %661 = vst.msk [vmem:[#allocation3 + $0x38] sm:$0xff] %vm433_vm0, %v658_v11 }
  0xc7   :  { %v180_v18 = vadd.f32 %v1719_v16, %v179_v14  ;;  %v386_v19 = vadd.f32 %v385_v15, %v261_v13  ;;  %v92_v14 = vld [vmem:[%s2549_s0 + $0x1a8] sm:$0xff] }
  0xc8   :  { %v304_v20 = vpop.f32.mrf.mxu1 }
  0xc9   :  { %v305_v22 = vadd.f32 %v304_v20, %v180_v18  ;;  %v429_v23 = vmax.f32 %v386_v19, 0.0  ;;  %226 = vmatmul.f32.gmra.mxu0 %v81_v17 }
  0xcb   :  { %v402_v25 = vmax.f32 %v305_v22, 0.0  ;;  %466 = vst.msk [vmem:[#allocation2 + $0x100] sm:$0xff] %vm433_vm0, %v429_v23  ;;  %351 = vmatmul.f32.gmra.mxu1 %v82_v21  ;;  %483 = vrot.lane.b32.xlu0 %v477_v24, %s1410_s21  ;;  %v93_v21 = vld [vmem:[%s2549_s0 + $0x1b0] sm:$0xff] }
  0xcc   :  { %v263_v26 = vpop.f32.mrf.mxu3  ;;  %v478_v37 = vld [vmem:[#allocation2 + $0x1a] sm:$0xff]  ;;  %v479_v51 = vld [vmem:[#allocation2 + $0x22] sm:$0x3]  ;;  %v659_v22 = vld [vmem:[#allocation2 + $0xe8] sm:$0x3] }
  0xcd   :  { %439 = vst.msk [vmem:[#allocation2 + $0x28] sm:$0xff] %vm433_vm0, %v402_v25  ;;  %v264_v27 = vadd.f32 %v1719_v16, %v263_v26  ;;  %v94_v25 = vld [vmem:[%s2549_s0 + $0x1b8] sm:$0xff] }
  0xce   :  { %v182_v28 = vpop.f32.mrf.mxu0  ;;  %v388_v29 = vpop.f32.mrf.mxu2  ;;  %662 = vst.msk [vmem:[#allocation3 + $0x58] sm:$0x3] %vm475_vm1, %v659_v22  ;;  %v738_v22 = vld [vmem:[%s2552_s3 + $0x48] sm:$0xff] }
  0xcf   :  { %v183_v31 = vadd.f32 %v1719_v16, %v182_v28  ;;  %v389_v32 = vadd.f32 %v388_v29, %v264_v27 }
  0xd0   :  { %v307_v33 = vpop.f32.mrf.mxu1 }
  0xd1   :  { %v308_v35 = vadd.f32 %v307_v33, %v183_v31  ;;  %v430_v36 = vmax.f32 %v389_v32, 0.0  ;;  %229 = vmatmul.f32.gmra.mxu0 %v83_v30 }
  0xd2   :  { %v681_v38 = vld [vmem:[#allocation2 + $0xfc] sm:$0xff] }
  0xd3   :  { %v403_v39 = vmax.f32 %v308_v35, 0.0  ;;  %467 = vst.msk [vmem:[#allocation2 + $0x108] sm:$0xff] %vm433_vm0, %v430_v36  ;;  %354 = vmatmul.f32.gmra.mxu1 %v84_v34  ;;  %485 = vrot.lane.b32.xlu0 %v478_v37, %s1410_s21 }
  0xd4   :  { %687 = vrot.lane.b32.xlu1 %v681_v38, %s1411_s29  ;;  %v266_v40 = vpop.f32.mrf.mxu3  ;;  %v497_v60 = vld [vmem:[#allocation2 + $0x24] sm:$0xff] }
  0xd5   :  { %440 = vst.msk [vmem:[#allocation2 + $0x30] sm:$0xff] %vm433_vm0, %v403_v39  ;;  %v267_v41 = vadd.f32 %v1719_v16, %v266_v40 }
  0xd6   :  { %v185_v42 = vpop.f32.mrf.mxu0  ;;  %v391_v43 = vpop.f32.mrf.mxu2 }
  0xd7   :  { %v186_v45 = vadd.f32 %v1719_v16, %v185_v42  ;;  %v392_v46 = vadd.f32 %v391_v43, %v267_v41 }
  0xd8   :  { %v310_v47 = vpop.f32.mrf.mxu1 }
  0xd9   :  { %v311_v49 = vadd.f32 %v310_v47, %v186_v45  ;;  %v431_v50 = vmax.f32 %v392_v46, 0.0  ;;  %232 = vmatmul.f32.gmra.mxu0 %v85_v44 }
  0xdb   :  { %v404_v52 = vmax.f32 %v311_v49, 0.0  ;;  %468 = vst.msk [vmem:[#allocation2 + $0x110] sm:$0xff] %vm433_vm0, %v431_v50  ;;  %357 = vmatmul.f32.gmra.mxu1 %v86_v48  ;;  %487 = vrot.lane.b32.xlu0 %v479_v51, %s1410_s21 }
  0xdc   :  { %v498_v53 = vld [vmem:[#allocation2 + $0x2c] sm:$0xff]  ;;  %v499_v63 = vld [vmem:[#allocation2 + $0x34] sm:$0x3]  ;;  %v269_v49 = vpop.f32.mrf.mxu3 }
  0xdd   :  { %441 = vst.msk [vmem:[#allocation2 + $0x38] sm:$0xff] %vm433_vm0, %v404_v52  ;;  %505 = vrot.lane.b32.xlu1 %v498_v53, %s1411_s29  ;;  %v270_v51 = vadd.f32 %v1719_v16, %v269_v49 }
  0xde   :  { %v188_v54 = vpop.f32.mrf.mxu0  ;;  %v394_v53 = vpop.f32.mrf.mxu2 }
  0xdf   :  { %v189_v56 = vadd.f32 %v1719_v16, %v188_v54  ;;  %v395_v54 = vadd.f32 %v394_v53, %v270_v51 }
  0xe0   :  { %v313_v57 = vpop.f32.mrf.mxu1 }
  0xe1   :  { %v314_v59 = vadd.f32 %v313_v57, %v189_v56  ;;  %235 = vmatmul.f32.gmra.mxu0 %v87_v55 }
  0xe2   :  { %v699_v61 = vld [vmem:[#allocation2 + $0x10e] sm:$0xff] }
  0xe3   :  { %v405_v62 = vmax.f32 %v314_v59, 0.0  ;;  %360 = vmatmul.f32.gmra.mxu1 %v88_v58  ;;  %503 = vrot.lane.b32.xlu0 %v497_v60, %s1411_s29  ;;  %v432_v58 = vmax.f32 %v395_v54, 0.0 }
  0xe4   :  { %705 = vrot.lane.b32.xlu2 %v699_v61, %s1412_s18  ;;  %v517_v8 = vld [vmem:[#allocation2 + $0x36] sm:$0xff] }
  0xe5   :  { %442 = vst.msk [vmem:[#allocation2 + $0x40] sm:$0xff] %vm433_vm0, %v405_v62  ;;  %507 = vrot.lane.b32.xlu1 %v499_v63, %s1411_s29 }
  0xe6   :  { %v191_v0 = vpop.f32.mrf.mxu0  ;;  %469 = vst.msk [vmem:[#allocation2 + $0x118] sm:$0xff] %vm433_vm0, %v432_v58 }
  0xe7   :  { %v192_v2 = vadd.f32 %v1719_v16, %v191_v0 }
  0xe8   :  { %v316_v3 = vpop.f32.mrf.mxu1 }
  0xe9   :  { %v317_v5 = vadd.f32 %v316_v3, %v192_v2  ;;  %238 = vmatmul.f32.gmra.mxu0 %v89_v1 }
  0xeb   :  { %v406_v6 = vmax.f32 %v317_v5, 0.0  ;;  %363 = vmatmul.f32.gmra.mxu1 %v90_v4  ;;  %v744_v5 = vld [vmem:[%s2552_s3 + $0x78] sm:$0xff] }
  0xec   :  { %v518_v7 = vld [vmem:[#allocation2 + $0x3e] sm:$0xff]  ;;  %v519_v18 = vld [vmem:[#allocation2 + $0x46] sm:$0x3]  ;;  %797 = vmatpush.msrb.mxu2 %v744_v5 }
  0xed   :  { %443 = vst.msk [vmem:[#allocation2 + $0x48] sm:$0xff] %vm433_vm0, %v406_v6  ;;  %525 = vrot.lane.b32.xlu2 %v518_v7, %s1412_s18  ;;  %523 = vrot.lane.b32.xlu1 %v517_v8, %s1412_s18  ;;  %v743_v7 = vld [vmem:[%s2552_s3 + $0x70] sm:$0xff]  ;;  %v757_v5 = vld [vmem:[%s2552_s3 + $0xe0] sm:$0xff] }
  0xee   :  { %v194_v9 = vpop.f32.mrf.mxu0  ;;  %798 = vmatpush.msrb.mxu2 %v743_v7 }
  0xef   :  { %v195_v12 = vadd.f32 %v1719_v16, %v194_v9 }
  0xf0   :  { %v319_v13 = vpop.f32.mrf.mxu1 }
  0xf1   :  { %v320_v15 = vadd.f32 %v319_v13, %v195_v12  ;;  %241 = vmatmul.f32.gmra.mxu0 %v91_v10  ;;  %v742_v10 = vld [vmem:[%s2552_s3 + $0x68] sm:$0xff]  ;;  %v741_v13 = vld [vmem:[%s2552_s3 + $0x60] sm:$0xff] }
  0xf2   :  { %799 = vmatpush.msrb.mxu2 %v742_v10  ;;  %v756_v10 = vld [vmem:[%s2552_s3 + $0xd8] sm:$0xff] }
  0xf3   :  { %v407_v17 = vmax.f32 %v320_v15, 0.0  ;;  %366 = vmatmul.f32.gmra.mxu1 %v92_v14 }
  0xf4   :  { %v537_v19 = vld [vmem:[#allocation2 + $0x48] sm:$0xff]  ;;  %800 = vmatpush.msrb.mxu2 %v741_v13 }
  0xf5   :  { %444 = vst.msk [vmem:[#allocation2 + $0x50] sm:$0xff] %vm433_vm0, %v407_v17  ;;  %527 = vrot.lane.b32.xlu2 %v519_v18, %s1412_s18  ;;  %v740_v17 = vld [vmem:[%s2552_s3 + $0x58] sm:$0xff]  ;;  %v755_v13 = vld [vmem:[%s2552_s3 + $0xd0] sm:$0xff] }
  0xf6   :  { %v197_v20 = vpop.f32.mrf.mxu0  ;;  %540 = vst.msk [vmem:[#allocation3 + $0x8] sm:$0xff] %vm433_vm0, %v537_v19  ;;  %801 = vmatpush.msrb.mxu2 %v740_v17  ;;  %v739_v19 = vld [vmem:[%s2552_s3 + $0x50] sm:$0xff] }
  0xf7   :  { %v198_v23 = vadd.f32 %v1719_v16, %v197_v20 }
  0xf8   :  { %v322_v24 = vpop.f32.mrf.mxu1  ;;  %802 = vmatpush.msrb.mxu2 %v739_v19 }
  0xf9   :  { %v323_v26 = vadd.f32 %v322_v24, %v198_v23  ;;  %244 = vmatmul.f32.gmra.mxu0 %v93_v21 }
  0xfa   :  { %803 = vmatpush.msrb.mxu2 %v738_v22 }
  0xfb   :  { %v408_v27 = vmax.f32 %v323_v26, 0.0  ;;  %369 = vmatmul.f32.gmra.mxu1 %v94_v25  ;;  %v737_v25 = vld [vmem:[%s2552_s3 + $0x40] sm:$0xff] }
  0xfc   :  { %v538_v28 = vld [vmem:[#allocation2 + $0x50] sm:$0xff]  ;;  %804 = vmatpush.msrb.mxu2 %v737_v25 }
  0xfd   :  { %445 = vst.msk [vmem:[#allocation2 + $0x58] sm:$0xff] %vm433_vm0, %v408_v27 }
  0xfe   :  { %v200_v29 = vpop.f32.mrf.mxu0  ;;  %541 = vst.msk [vmem:[#allocation3 + $0x28] sm:$0xff] %vm433_vm0, %v538_v28  ;;  %v736_v28 = vld [vmem:[%s2552_s3 + $0x38] sm:$0xff] }
  0xff   :  { %v201_v30 = vadd.f32 %v1719_v16, %v200_v29  ;;  %805 = vmatpush.msrb.mxu2 %v736_v28  ;;  %v664_v28 = vld [vmem:[#allocation2 + $0xf2] sm:$0xff] }
 0x100   :  { %v325_v31 = vpop.f32.mrf.mxu1 }
 0x101   :  { %v326_v32 = vadd.f32 %v325_v31, %v201_v30  ;;  %v735_v30 = vld [vmem:[%s2552_s3 + $0x30] sm:$0xff] }
 0x102   :  { %806 = vmatpush.msrb.mxu2 %v735_v30 }
 0x103   :  { %v409_v33 = vmax.f32 %v326_v32, 0.0 }
 0x104   :  { %v539_v34 = vld [vmem:[#allocation2 + $0x58] sm:$0x3] }
 0x105   :  { %446 = vst.msk [vmem:[#allocation2 + $0x60] sm:$0xff] %vm433_vm0, %v409_v33 }
 0x106   :  { %v203_v35 = vpop.f32.mrf.mxu0  ;;  %542 = vst.msk [vmem:[#allocation3 + $0x48] sm:$0x3] %vm475_vm1, %v539_v34  ;;  %v734_v34 = vld [vmem:[%s2552_s3 + $0x28] sm:$0xff] }
 0x107   :  { %v204_v36 = vadd.f32 %v1719_v16, %v203_v35  ;;  %807 = vmatpush.msrb.mxu2 %v734_v34 }
 0x108   :  { %v328_v37 = vpop.f32.mrf.mxu1 }
 0x109   :  { %v329_v38 = vadd.f32 %v328_v37, %v204_v36  ;;  %v733_v37 = vld [vmem:[%s2552_s3 + $0x20] sm:$0xff] }
 0x10a   :  { %808 = vmatpush.msrb.mxu2 %v733_v37 }
 0x10b   :  { %v410_v39 = vmax.f32 %v329_v38, 0.0 }
 0x10c   :  { %v543_v40 = vld [vmem:[#allocation2 + $0x5a] sm:$0xff] }
 0x10d   :  { %447 = vst.msk [vmem:[#allocation2 + $0x68] sm:$0xff] %vm433_vm0, %v410_v39  ;;  %549 = vrot.lane.b32.xlu1 %v543_v40, %s1410_s21  ;;  %v732_v40 = vld [vmem:[%s2552_s3 + $0x18] sm:$0xff] }
 0x10e   :  { %v206_v41 = vpop.f32.mrf.mxu0  ;;  %809 = vmatpush.msrb.mxu2 %v732_v40 }
 0x10f   :  { %v207_v42 = vadd.f32 %v1719_v16, %v206_v41 }
 0x110   :  { %v331_v43 = vpop.f32.mrf.mxu1 }
 0x111   :  { %v332_v44 = vadd.f32 %v331_v43, %v207_v42  ;;  %v731_v42 = vld [vmem:[%s2552_s3 + $0x10] sm:$0xff] }
 0x112   :  { %810 = vmatpush.msrb.mxu2 %v731_v42 }
 0x113   :  { %v411_v45 = vmax.f32 %v332_v44, 0.0 }
 0x114   :  { %v544_v46 = vld [vmem:[#allocation2 + $0x62] sm:$0xff]  ;;  %v545_v57 = vld [vmem:[#allocation2 + $0x6a] sm:$0x3] }
 0x115   :  { %448 = vst.msk [vmem:[#allocation2 + $0x70] sm:$0xff] %vm433_vm0, %v411_v45  ;;  %551 = vrot.lane.b32.xlu0 %v544_v46, %s1410_s21  ;;  %v730_v46 = vld [vmem:[%s2552_s3 + $0x8] sm:$0xff] }
 0x116   :  { %v209_v47 = vpop.f32.mrf.mxu0  ;;  %811 = vmatpush.msrb.mxu2 %v730_v46  ;;  %v745_v46 = vld [vmem:[%s2552_s3 + $0x80] sm:$0xff] }
 0x117   :  { %v210_v48 = vadd.f32 %v1719_v16, %v209_v47 }
 0x118   :  { %v334_v50 = vpop.f32.mrf.mxu1 }
 0x119   :  { %v335_v52 = vadd.f32 %v334_v50, %v210_v48  ;;  %v729_v50 = vld [vmem:[%s2552_s3] sm:$0xff] }
 0x11a   :  { %812 = vmatpush.msrb.mxu2 %v729_v50  ;;  %v792_v50 = vld [vmem:[%s2552_s3 + $0x1f8] sm:$0xff] }
 0x11b   :  { %v412_v55 = vmax.f32 %v335_v52, 0.0 }
 0x11c   :  { %v561_v56 = vld [vmem:[#allocation2 + $0x6c] sm:$0xff] }
 0x11d   :  { %449 = vst.msk [vmem:[#allocation2 + $0x78] sm:$0xff] %vm433_vm0, %v412_v55  ;;  %567 = vrot.lane.b32.xlu2 %v561_v56, %s1411_s29  ;;  %553 = vrot.lane.b32.xlu0 %v545_v57, %s1410_s21 }
 0x11e   :  { %v212_v59 = vpop.f32.mrf.mxu0 }
 0x11f   :  { %v213_v60 = vadd.f32 %v1719_v16, %v212_v59 }
 0x120   :  { %v337_v61 = vpop.f32.mrf.mxu1 }
 0x121   :  { %v338_v62 = vadd.f32 %v337_v61, %v213_v60 }
 0x123   :  { %v413_v63 = vmax.f32 %v338_v62, 0.0  ;;  %v760_v62 = vld [vmem:[%s2552_s3 + $0xf8] sm:$0xff] }
 0x124   :  { %v562_v0 = vld [vmem:[#allocation2 + $0x74] sm:$0xff]  ;;  %v563_v9 = vld [vmem:[#allocation2 + $0x7c] sm:$0x3]  ;;  %823 = vmatpush.msrb.mxu3 %v760_v62 }
 0x125   :  { %450 = vst.msk [vmem:[#allocation2 + $0x80] sm:$0xff] %vm433_vm0, %v413_v63  ;;  %569 = vrot.lane.b32.xlu1 %v562_v0, %s1411_s29  ;;  %v759_v0 = vld [vmem:[%s2552_s3 + $0xf0] sm:$0xff]  ;;  %v789_v62 = vld [vmem:[%s2552_s3 + $0x1e0] sm:$0xff] }
 0x126   :  { %v215_v1 = vpop.f32.mrf.mxu0  ;;  %824 = vmatpush.msrb.mxu3 %v759_v0 }
 0x127   :  { %v216_v2 = vadd.f32 %v1719_v16, %v215_v1 }
 0x128   :  { %v340_v3 = vpop.f32.mrf.mxu1 }
 0x129   :  { %v341_v4 = vadd.f32 %v340_v3, %v216_v2  ;;  %v758_v3 = vld [vmem:[%s2552_s3 + $0xe8] sm:$0xff] }
 0x12a   :  { %825 = vmatpush.msrb.mxu3 %v758_v3  ;;  %v786_v3 = vld [vmem:[%s2552_s3 + $0x1c8] sm:$0xff] }
 0x12b   :  { %v414_v6 = vmax.f32 %v341_v4, 0.0 }
 0x12c   :  { %v579_v8 = vld [vmem:[#allocation2 + $0x7e] sm:$0xff]  ;;  %826 = vmatpush.msrb.mxu3 %v757_v5 }
 0x12d   :  { %451 = vst.msk [vmem:[#allocation2 + $0x88] sm:$0xff] %vm433_vm0, %v414_v6  ;;  %585 = vrot.lane.b32.xlu2 %v579_v8, %s1412_s18  ;;  %571 = vrot.lane.b32.xlu1 %v563_v9, %s1411_s29 }
 0x12e   :  { %v218_v11 = vpop.f32.mrf.mxu0  ;;  %827 = vmatpush.msrb.mxu3 %v756_v10  ;;  %v700_v10 = vld [vmem:[#allocation2 + $0x116] sm:$0xff] }
 0x12f   :  { %v219_v12 = vadd.f32 %v1719_v16, %v218_v11 }
 0x130   :  { %v343_v14 = vpop.f32.mrf.mxu1  ;;  %828 = vmatpush.msrb.mxu3 %v755_v13 }
 0x131   :  { %v344_v15 = vadd.f32 %v343_v14, %v219_v12 }
 0x133   :  { %v415_v18 = vmax.f32 %v344_v15, 0.0  ;;  %v754_v15 = vld [vmem:[%s2552_s3 + $0xc8] sm:$0xff] }
 0x134   :  { %v580_v20 = vld [vmem:[#allocation2 + $0x86] sm:$0xff]  ;;  %v581_v31 = vld [vmem:[#allocation2 + $0x8e] sm:$0x3]  ;;  %829 = vmatpush.msrb.mxu3 %v754_v15  ;;  %v781_v15 = vld [vmem:[%s2552_s3 + $0x1a0] sm:$0xff] }
 0x135   :  { %452 = vst.msk [vmem:[#allocation2 + $0x90] sm:$0xff] %vm433_vm0, %v415_v18  ;;  %v1892_v21 = vpop.permute.xlu0 %669  ;;  %587 = vrot.lane.b32.xlu2 %v580_v20, %s1412_s18  ;;  %v753_v20 = vld [vmem:[%s2552_s3 + $0xc0] sm:$0xff] }
 0x136   :  { %v221_v23 = vpop.f32.mrf.mxu0  ;;  %830 = vmatpush.msrb.mxu3 %v753_v20 }
 0x137   :  { %v222_v24 = vadd.f32 %v1719_v16, %v221_v23 }
 0x138   :  { %v346_v26 = vpop.f32.mrf.mxu1 }
 0x139   :  { %v347_v27 = vadd.f32 %v346_v26, %v222_v24  ;;  %v752_v24 = vld [vmem:[%s2552_s3 + $0xb8] sm:$0xff]  ;;  %v751_v26 = vld [vmem:[%s2552_s3 + $0xb0] sm:$0xff] }
 0x13a   :  { %831 = vmatpush.msrb.mxu3 %v752_v24  ;;  %v774_v24 = vld [vmem:[%s2552_s3 + $0x168] sm:$0xff] }
 0x13b   :  { %v416_v29 = vmax.f32 %v347_v27, 0.0 }
 0x13c   :  { %v597_v32 = vld [vmem:[#allocation2 + $0x90] sm:$0xff]  ;;  %832 = vmatpush.msrb.mxu3 %v751_v26 }
 0x13d   :  { %453 = vst.msk [vmem:[#allocation2 + $0x98] sm:$0xff] %vm433_vm0, %v416_v29  ;;  %589 = vrot.lane.b32.xlu2 %v581_v31, %s1412_s18  ;;  %v484_v33 = vpop.permute.xlu0 %483  ;;  %v750_v29 = vld [vmem:[%s2552_s3 + $0xa8] sm:$0xff] }
 0x13e   :  { %493 = vst.msk [vmem:[#allocation3] sm:$0xff] %vm492_vm2, %v484_v33  ;;  %v224_v35 = vpop.f32.mrf.mxu0  ;;  %v1925_v43 = vpop.permute.xlu2 %705  ;;  %833 = vmatpush.msrb.mxu3 %v750_v29  ;;  %v749_v33 = vld [vmem:[%s2552_s3 + $0xa0] sm:$0xff] }
 0x13f   :  { %v225_v36 = vadd.f32 %v1719_v16, %v224_v35  ;;  %600 = vst.msk [vmem:[#allocation3 + $0x10] sm:$0xff] %vm433_vm0, %v597_v32 }
 0x140   :  { %v349_v38 = vpop.f32.mrf.mxu1  ;;  %834 = vmatpush.msrb.mxu3 %v749_v33  ;;  %v772_v33 = vld [vmem:[%s2552_s3 + $0x158] sm:$0xff] }
 0x141   :  { %v350_v39 = vadd.f32 %v349_v38, %v225_v36  ;;  %v748_v36 = vld [vmem:[%s2552_s3 + $0x98] sm:$0xff]  ;;  %v747_v38 = vld [vmem:[%s2552_s3 + $0x90] sm:$0xff] }
 0x142   :  { %835 = vmatpush.msrb.mxu3 %v748_v36 }
 0x143   :  { %v417_v41 = vmax.f32 %v350_v39, 0.0 }
 0x144   :  { %v598_v44 = vld [vmem:[#allocation2 + $0x98] sm:$0xff]  ;;  %836 = vmatpush.msrb.mxu3 %v747_v38  ;;  %v768_v38 = vld [vmem:[%s2552_s3 + $0x138] sm:$0xff] }
 0x145   :  { %454 = vst.msk [vmem:[#allocation2 + $0xa0] sm:$0xff] %vm433_vm0, %v417_v41  ;;  %v486_v45 = vpop.permute.xlu0 %485  ;;  %v746_v41 = vld [vmem:[%s2552_s3 + $0x88] sm:$0xff] }
 0x146   :  { %494 = vst.msk [vmem:[#allocation3 + $0x20] sm:$0xff] %vm492_vm2, %v486_v45  ;;  %v227_v47 = vpop.f32.mrf.mxu0  ;;  %v1932_v48 = vpop.permute.xlu1 %687  ;;  %837 = vmatpush.msrb.mxu3 %v746_v41  ;;  %v765_v41 = vld [vmem:[%s2552_s3 + $0x120] sm:$0xff] }
 0x147   :  { %v228_v49 = vadd.f32 %v1719_v16, %v227_v47  ;;  %601 = vst.msk [vmem:[#allocation3 + $0x30] sm:$0xff] %vm433_vm0, %v598_v44  ;;  %v526_v56 = vpop.permute.xlu2 %525 }
 0x148   :  { %v352_v51 = vpop.f32.mrf.mxu1  ;;  %838 = vmatpush.msrb.mxu3 %v745_v46  ;;  %v761_v46 = vld [vmem:[%s2552_s3 + $0x100] sm:$0xff] }
 0x149   :  { %v353_v52 = vadd.f32 %v352_v51, %v228_v49 }
 0x14a   :  { %875 = vmatpush.msra.mxu3 %v792_v50 }
 0x14b   :  { %v418_v53 = vmax.f32 %v353_v52, 0.0  ;;  %v791_v52 = vld [vmem:[%s2552_s3 + $0x1f0] sm:$0xff] }
 0x14c   :  { %v599_v54 = vld [vmem:[#allocation2 + $0xa0] sm:$0x3]  ;;  %876 = vmatpush.msra.mxu3 %v791_v52 }
 0x14d   :  { %455 = vst.msk [vmem:[#allocation2 + $0xa8] sm:$0xff] %vm433_vm0, %v418_v53  ;;  %v488_v55 = vpop.permute.xlu0 %487 }
 0x14e   :  { %496 = vst.msk [vmem:[#allocation3 + $0x40] sm:$0x3] %vm495_vm3, %v488_v55  ;;  %v230_v57 = vpop.f32.mrf.mxu0  ;;  %v665_v55 = vld [vmem:[#allocation2 + $0xfa] sm:$0x3] }
 0x14f   :  { %v231_v58 = vadd.f32 %v1719_v16, %v230_v57  ;;  %v506_v59 = vpop.permute.xlu1 %505  ;;  %602 = vst.msk [vmem:[#allocation3 + $0x50] sm:$0x3] %vm475_vm1, %v599_v54  ;;  %v528_v8 = vpop.permute.xlu2 %527  ;;  %v682_v54 = vld [vmem:[#allocation2 + $0x104] sm:$0xff] }
 0x150   :  { %514 = vst.msk [vmem:[#allocation3 + $0x20] sm:$0xff] %vm512_vm4, %v506_v59  ;;  %v355_v60 = vpop.f32.mrf.mxu1 }
 0x151   :  { %534 = vst.msk [vmem:[#allocation3 + $0x20] sm:$0xff] %vm532_vm5, %v526_v56  ;;  %v356_v61 = vadd.f32 %v355_v60, %v231_v58  ;;  %v790_v56 = vld [vmem:[%s2552_s3 + $0x1e8] sm:$0xff] }
 0x152   :  { %877 = vmatpush.msra.mxu3 %v790_v56 }
 0x153   :  { %v419_v63 = vmax.f32 %v356_v61, 0.0 }
 0x154   :  { %v603_v1 = vld [vmem:[#allocation2 + $0xa2] sm:$0xff]  ;;  %878 = vmatpush.msra.mxu3 %v789_v62 }
 0x155   :  { %456 = vst.msk [vmem:[#allocation2 + $0xb0] sm:$0xff] %vm433_vm0, %v419_v63  ;;  %609 = vrot.lane.b32.xlu0 %v603_v1, %s1410_s21  ;;  %v504_v2 = vpop.permute.xlu0 %503  ;;  %v788_v63 = vld [vmem:[%s2552_s3 + $0x1d8] sm:$0xff]  ;;  %v787_v1 = vld [vmem:[%s2552_s3 + $0x1d0] sm:$0xff] }
 0x156   :  { %513 = vst.msk [vmem:[#allocation3] sm:$0xff] %vm512_vm4, %v504_v2  ;;  %v233_v4 = vpop.f32.mrf.mxu0  ;;  %879 = vmatpush.msra.mxu3 %v788_v63 }
 0x157   :  { %v234_v6 = vadd.f32 %v1719_v16, %v233_v4  ;;  %v508_v7 = vpop.permute.xlu1 %507 }
 0x158   :  { %516 = vst.msk [vmem:[#allocation3 + $0x40] sm:$0x3] %vm515_vm6, %v508_v7  ;;  %v358_v9 = vpop.f32.mrf.mxu1  ;;  %v721_v45 = vld [vmem:[#allocation3 + $0x20] sm:$0xff]  ;;  %880 = vmatpush.msra.mxu3 %v787_v1  ;;  %v784_v7 = vld [vmem:[%s2552_s3 + $0x1b8] sm:$0xff] }
 0x159   :  { %536 = vst.msk [vmem:[#allocation3 + $0x40] sm:$0x3] %vm535_vm7, %v528_v8  ;;  %v359_v11 = vadd.f32 %v358_v9, %v234_v6  ;;  %v785_v6 = vld [vmem:[%s2552_s3 + $0x1c0] sm:$0xff]  ;;  %v783_v8 = vld [vmem:[%s2552_s3 + $0x1b0] sm:$0xff] }
 0x15a   :  { %881 = vmatpush.msra.mxu3 %v786_v3 }
 0x15b   :  { %v420_v12 = vmax.f32 %v359_v11, 0.0  ;;  %v683_v11 = vld [vmem:[#allocation2 + $0x10c] sm:$0x3] }
 0x15c   :  { %v604_v14 = vld [vmem:[#allocation2 + $0xaa] sm:$0xff]  ;;  %v605_v40 = vld [vmem:[#allocation2 + $0xb2] sm:$0x3]  ;;  %882 = vmatpush.msra.mxu3 %v785_v6 }
 0x15d   :  { %457 = vst.msk [vmem:[#allocation2 + $0xb8] sm:$0xff] %vm433_vm0, %v420_v12  ;;  %611 = vrot.lane.b32.xlu0 %v604_v14, %s1410_s21  ;;  %v782_v12 = vld [vmem:[%s2552_s3 + $0x1a8] sm:$0xff] }
 0x15e   :  { %v236_v17 = vpop.f32.mrf.mxu0  ;;  %883 = vmatpush.msra.mxu3 %v784_v7 }
 0x15f   :  { %v237_v18 = vadd.f32 %v1719_v16, %v236_v17  ;;  %v524_v19 = vpop.permute.xlu1 %523 }
 0x160   :  { %533 = vst.msk [vmem:[#allocation3] sm:$0xff] %vm532_vm5, %v524_v19  ;;  %v361_v22 = vpop.f32.mrf.mxu1  ;;  %v725_v59 = vld [vmem:[#allocation3 + $0x40] sm:$0x3]  ;;  %884 = vmatpush.msra.mxu3 %v783_v8  ;;  %v777_v19 = vld [vmem:[%s2552_s3 + $0x180] sm:$0xff] }
 0x161   :  { %v362_v23 = vadd.f32 %v361_v22, %v237_v18  ;;  %v776_v22 = vld [vmem:[%s2552_s3 + $0x178] sm:$0xff] }
 0x162   :  { %885 = vmatpush.msra.mxu3 %v782_v12  ;;  %849 = vmatpush.msra.mxu2 %v776_v22 }
 0x163   :  { %v421_v25 = vmax.f32 %v362_v23, 0.0  ;;  %v775_v23 = vld [vmem:[%s2552_s3 + $0x170] sm:$0xff] }
 0x164   :  { %v621_v27 = vld [vmem:[#allocation2 + $0xb4] sm:$0xff]  ;;  %886 = vmatpush.msra.mxu3 %v781_v15  ;;  %850 = vmatpush.msra.mxu2 %v775_v23 }
 0x165   :  { %458 = vst.msk [vmem:[#allocation2 + $0xc0] sm:$0xff] %vm433_vm0, %v421_v25  ;;  %627 = vrot.lane.b32.xlu1 %v621_v27, %s1411_s29  ;;  %671 = vrot.lane.b32.xlu0 %v664_v28, %s1410_s21  ;;  %v701_v25 = vld [vmem:[#allocation2 + $0x11e] sm:$0x3] }
 0x166   :  { %v239_v30 = vpop.f32.mrf.mxu0  ;;  %851 = vmatpush.msra.mxu2 %v774_v24  ;;  %v959_v24 = vld [vmem:[%s2554_s5 + $0x68] sm:$0xff] }
 0x167   :  { %v240_v31 = vadd.f32 %v1719_v16, %v239_v30  ;;  %v717_v32 = vld [vmem:[#allocation3] sm:$0xff] }
 0x168   :  { %v364_v34 = vpop.f32.mrf.mxu1  ;;  %813 = vmatmul.f32.vlgmr.msrb.gmra.mxu2 %v717_v32  ;;  %v773_v32 = vld [vmem:[%s2552_s3 + $0x160] sm:$0xff] }
 0x169   :  { %v365_v35 = vadd.f32 %v364_v34, %v240_v31  ;;  %852 = vmatpush.msra.mxu2 %v773_v32  ;;  %v771_v34 = vld [vmem:[%s2552_s3 + $0x150] sm:$0xff] }
 0x16b   :  { %v422_v37 = vmax.f32 %v365_v35, 0.0  ;;  %853 = vmatpush.msra.mxu2 %v772_v33  ;;  %v770_v35 = vld [vmem:[%s2552_s3 + $0x148] sm:$0xff]  ;;  %v957_v33 = vld [vmem:[%s2554_s5 + $0x58] sm:$0xff] }
 0x16c   :  { %v622_v39 = vld [vmem:[#allocation2 + $0xbc] sm:$0xff]  ;;  %v623_v2 = vld [vmem:[#allocation2 + $0xc4] sm:$0x3] }
 0x16d   :  { %459 = vst.msk [vmem:[#allocation2 + $0xc8] sm:$0xff] %vm433_vm0, %v422_v37  ;;  %629 = vrot.lane.b32.xlu1 %v622_v39, %s1411_s29  ;;  %613 = vrot.lane.b32.xlu0 %v605_v40, %s1410_s21  ;;  %v769_v37 = vld [vmem:[%s2552_s3 + $0x140] sm:$0xff]  ;;  %v767_v39 = vld [vmem:[%s2552_s3 + $0x130] sm:$0xff] }
 0x16e   :  { %v242_v42 = vpop.f32.mrf.mxu0  ;;  %854 = vmatpush.msra.mxu2 %v771_v34  ;;  %v766_v40 = vld [vmem:[%s2552_s3 + $0x128] sm:$0xff]  ;;  %v974_v34 = vld [vmem:[%s2554_s5 + $0xe0] sm:$0xff] }
 0x16f   :  { %v243_v44 = vadd.f32 %v1719_v16, %v242_v42  ;;  %v764_v42 = vld [vmem:[%s2552_s3 + $0x118] sm:$0xff] }
 0x170   :  { %v367_v47 = vpop.f32.mrf.mxu1  ;;  %816 = vmatmul.f32.gmra.mxu2 %v721_v45  ;;  %v762_v45 = vld [vmem:[%s2552_s3 + $0x108] sm:$0xff] }
 0x171   :  { %v368_v49 = vadd.f32 %v367_v47, %v243_v44  ;;  %855 = vmatpush.msra.mxu2 %v770_v35  ;;  %v763_v44 = vld [vmem:[%s2552_s3 + $0x110] sm:$0xff] }
 0x173   :  { %v423_v51 = vmax.f32 %v368_v49, 0.0  ;;  %856 = vmatpush.msra.mxu2 %v769_v37  ;;  %v973_v37 = vld [vmem:[%s2554_s5 + $0xd8] sm:$0xff] }
 0x174   :  { %v639_v53 = vld [vmem:[#allocation2 + $0xc6] sm:$0xff] }
 0x175   :  { %460 = vst.msk [vmem:[#allocation2 + $0xd0] sm:$0xff] %vm433_vm0, %v423_v51  ;;  %645 = vrot.lane.b32.xlu2 %v639_v53, %s1412_s18  ;;  %689 = vrot.lane.b32.xlu1 %v682_v54, %s1411_s29 }
 0x176   :  { %673 = vrot.lane.b32.xlu0 %v665_v55, %s1410_s21  ;;  %v245_v57 = vpop.f32.mrf.mxu0  ;;  %857 = vmatpush.msra.mxu2 %v768_v38  ;;  %v955_v38 = vld [vmem:[%s2554_s5 + $0x48] sm:$0xff] }
 0x177   :  { %v246_v58 = vadd.f32 %v1719_v16, %v245_v57  ;;  %v568_v4 = vpop.permute.xlu2 %567 }
 0x178   :  { %819 = vmatmul.f32.gmra.mxu2 %v725_v59  ;;  %v370_v60 = vpop.f32.mrf.mxu1 }
 0x179   :  { %v371_v61 = vadd.f32 %v370_v60, %v246_v58  ;;  %858 = vmatpush.msra.mxu2 %v767_v39  ;;  %v972_v39 = vld [vmem:[%s2554_s5 + $0xd0] sm:$0xff] }
 0x17b   :  { %v424_v0 = vmax.f32 %v371_v61, 0.0  ;;  %859 = vmatpush.msra.mxu2 %v766_v40  ;;  %v954_v40 = vld [vmem:[%s2554_s5 + $0x40] sm:$0xff] }
 0x17c   :  { %v640_v16 = vld [vmem:[#allocation2 + $0xce] sm:$0xff]  ;;  %v641_v17 = vld [vmem:[#allocation2 + $0xd6] sm:$0x3] }
 0x17d   :  { %461 = vst.msk [vmem:[#allocation2 + $0xd8] sm:$0xff] %vm433_vm0, %v424_v0  ;;  %647 = vrot.lane.b32.xlu2 %v640_v16, %s1412_s18  ;;  %631 = vrot.lane.b32.xlu1 %v623_v2, %s1411_s29 }
 0x17e   :  { %860 = vmatpush.msra.mxu2 %v765_v41  ;;  %v971_v41 = vld [vmem:[%s2554_s5 + $0xc8] sm:$0xff] }
 0x17f   :  { %v550_v5 = vpop.permute.xlu1 %549 }
 0x180   :  { %558 = vst.msk [vmem:[#allocation3 + $0x8] sm:$0xff] %vm492_vm2, %v550_v5  ;;  %861 = vmatpush.msra.mxu2 %v764_v42 }
 0x181   :  { %576 = vst.msk [vmem:[#allocation3 + $0x8] sm:$0xff] %vm512_vm4, %v568_v4 }
 0x182   :  { %862 = vmatpush.msra.mxu2 %v763_v44  ;;  %v953_v44 = vld [vmem:[%s2554_s5 + $0x38] sm:$0xff] }
 0x184   :  { %v657_v9 = vld [vmem:[#allocation2 + $0xd8] sm:$0xff]  ;;  %863 = vmatpush.msra.mxu2 %v762_v45 }
 0x185   :  { %660 = vst.msk [vmem:[#allocation3 + $0x18] sm:$0xff] %vm433_vm0, %v657_v9  ;;  %707 = vrot.lane.b32.xlu2 %v700_v10, %s1412_s18  ;;  %691 = vrot.lane.b32.xlu1 %v683_v11, %s1411_s29  ;;  %v1379_v9 = vld [vmem:[%s2553_s4] ss:$0 sm:$0xff] }
 0x186   :  { %678 = vst.msk [vmem:[#allocation3 + $0x18] sm:$0xff] %vm492_vm2, %v1892_v21  ;;  %v780_v21 = vld [vmem:[%s2552_s3 + $0x198] sm:$0xff]  ;;  %864 = vmatpush.msra.mxu2 %v761_v46 }
 0x187   :  { %696 = vst.msk [vmem:[#allocation3 + $0x18] sm:$0xff] %vm512_vm4, %v1932_v48  ;;  %v586_v13 = vpop.permute.xlu2 %585  ;;  %v552_v14 = vpop.permute.xlu0 %551  ;;  %v779_v48 = vld [vmem:[%s2552_s3 + $0x190] sm:$0xff]  ;;  %887 = vmatpush.msra.mxu3 %v780_v21 }
 0x188   :  { %714 = vst.msk [vmem:[#allocation3 + $0x18] sm:$0xff] %vm532_vm5, %v1925_v43  ;;  %v778_v43 = vld [vmem:[%s2552_s3 + $0x188] sm:$0xff]  ;;  %s1415_s3 = smov [#allocation6]  }
 0x189   :  { %594 = vst.msk [vmem:[#allocation3 + $0x8] sm:$0xff] %vm532_vm5, %v586_v13  ;;  %888 = vmatpush.msra.mxu3 %v779_v48  ;;  %s1320_s22 = sshll.u32 %s1415_s3, 4  ;;  %s1321_s22 = int_to_ptr.vmem [resolvable:$true] %s1320_s22 }
 0x18a   :  { %559 = vst.msk [vmem:[#allocation3 + $0x28] sm:$0xff] %vm492_vm2, %v552_v14 }
 0x18b   :  { %889 = vmatpush.msra.mxu3 %v778_v43 }
 0x18d   :  { %649 = vrot.lane.b32.xlu2 %v641_v17, %s1412_s18  ;;  %890 = vmatpush.msra.mxu3 %v777_v19  ;;  %v960_v19 = vld [vmem:[%s2554_s5 + $0x70] sm:$0xff] }
 0x18f   :  { %v554_v18 = vpop.permute.xlu0 %553  ;;  %v588_v26 = vpop.permute.xlu2 %587  ;;  %v720_v36 = vld [vmem:[#allocation3 + $0x18] sm:$0xff] }
 0x190   :  { %560 = vst.msk [vmem:[#allocation3 + $0x48] sm:$0x3] %vm495_vm3, %v554_v18  ;;  %v718_v20 = vld [vmem:[#allocation3 + $0x8] sm:$0xff]  ;;  %v961_v18 = vld [vmem:[%s2554_s5 + $0x78] sm:$0xff] }
 0x191   :  { %839 = vmatmul.f32.vlgmr.msrb.gmra.mxu3 %v718_v20  ;;  %1038 = vmatpush.msrb.mxu2 %v961_v18  ;;  %v986_v18 = vld [vmem:[%s2554_s5 + $0x140] sm:$0xff] }
 0x193   :  { %1039 = vmatpush.msrb.mxu2 %v960_v19 }
 0x195   :  { %709 = vrot.lane.b32.xlu2 %v701_v25, %s1412_s18  ;;  %v977_v25 = vld [vmem:[%s2554_s5 + $0xf8] sm:$0xff]  ;;  %1040 = vmatpush.msrb.mxu2 %v959_v24  ;;  %v984_v24 = vld [vmem:[%s2554_s5 + $0x130] sm:$0xff] }
 0x196   :  { %1058 = vmatpush.msrb.mxu3 %v977_v25  ;;  %v1003_v25 = vld [vmem:[%s2554_s5 + $0x1c8] sm:$0xff] }
 0x197   :  { %v570_v27 = vpop.permute.xlu1 %569  ;;  %v590_v29 = vpop.permute.xlu2 %589 }
 0x198   :  { %577 = vst.msk [vmem:[#allocation3 + $0x28] sm:$0xff] %vm512_vm4, %v570_v27 }
 0x199   :  { %595 = vst.msk [vmem:[#allocation3 + $0x28] sm:$0xff] %vm532_vm5, %v588_v26 }
 0x19f   :  { %v572_v28 = vpop.permute.xlu1 %571 }
 0x1a0   :  { %578 = vst.msk [vmem:[#allocation3 + $0x48] sm:$0x3] %vm515_vm6, %v572_v28  ;;  %v722_v30 = vld [vmem:[#allocation3 + $0x28] sm:$0xff] }
 0x1a1   :  { %596 = vst.msk [vmem:[#allocation3 + $0x48] sm:$0x3] %vm535_vm7, %v590_v29  ;;  %842 = vmatmul.f32.gmra.mxu3 %v722_v30  ;;  %v976_v28 = vld [vmem:[%s2554_s5 + $0xf0] sm:$0xff]  ;;  %v958_v30 = vld [vmem:[%s2554_s5 + $0x60] sm:$0xff] }
 0x1a2   :  { %1059 = vmatpush.msrb.mxu3 %v976_v28  ;;  %1041 = vmatpush.msrb.mxu2 %v958_v30  ;;  %v982_v28 = vld [vmem:[%s2554_s5 + $0x120] sm:$0xff]  ;;  %v981_v30 = vld [vmem:[%s2554_s5 + $0x118] sm:$0xff] }
 0x1a4   :  { %1042 = vmatpush.msrb.mxu2 %v957_v33 }
 0x1a8   :  { %v726_v31 = vld [vmem:[#allocation3 + $0x48] sm:$0x3] }
 0x1a9   :  { %845 = vmatmul.f32.gmra.mxu3 %v726_v31  ;;  %v975_v31 = vld [vmem:[%s2554_s5 + $0xe8] sm:$0xff] }
 0x1aa   :  { %1060 = vmatpush.msrb.mxu3 %v975_v31  ;;  %v1000_v31 = vld [vmem:[%s2554_s5 + $0x1b0] sm:$0xff] }
 0x1ac   :  { %1061 = vmatpush.msrb.mxu3 %v974_v34 }
 0x1ae   :  { %1062 = vmatpush.msrb.mxu3 %v973_v37  ;;  %v998_v37 = vld [vmem:[%s2554_s5 + $0x1a0] sm:$0xff] }
 0x1b0   :  { %1063 = vmatpush.msrb.mxu3 %v972_v39  ;;  %v997_v39 = vld [vmem:[%s2554_s5 + $0x198] sm:$0xff] }
 0x1b1   :  { %891 = vmatmul.f32.vlgmr.msra.gmra.mxu3 %v720_v36  ;;  %v956_v36 = vld [vmem:[%s2554_s5 + $0x50] sm:$0xff] }
 0x1b2   :  { %1043 = vmatpush.msrb.mxu2 %v956_v36  ;;  %1064 = vmatpush.msrb.mxu3 %v971_v41  ;;  %v979_v36 = vld [vmem:[%s2554_s5 + $0x108] sm:$0xff] }
 0x1b3   :  { %v995_v41 = vld [vmem:[%s2554_s5 + $0x188] sm:$0xff] }
 0x1b4   :  { %1044 = vmatpush.msrb.mxu2 %v955_v38  ;;  %v978_v38 = vld [vmem:[%s2554_s5 + $0x100] sm:$0xff] }
 0x1b6   :  { %1045 = vmatpush.msrb.mxu2 %v954_v40  ;;  %v996_v40 = vld [vmem:[%s2554_s5 + $0x190] sm:$0xff] }
 0x1b8   :  { %1046 = vmatpush.msrb.mxu2 %v953_v44 }
 0x1c7   :  { %v610_v47 = vpop.permute.xlu0 %609 }
 0x1c8   :  { %618 = vst.msk [vmem:[#allocation3 + $0x10] sm:$0xff] %vm492_vm2, %v610_v47 }
 0x1cf   :  { %v612_v49 = vpop.permute.xlu0 %611  ;;  %v646_v50 = vpop.permute.xlu2 %645 }
 0x1d0   :  { %619 = vst.msk [vmem:[#allocation3 + $0x30] sm:$0xff] %vm492_vm2, %v612_v49 }
 0x1d7   :  { %v628_v51 = vpop.permute.xlu1 %627  ;;  %v672_v52 = vpop.permute.xlu0 %671 }
 0x1d8   :  { %636 = vst.msk [vmem:[#allocation3 + $0x10] sm:$0xff] %vm512_vm4, %v628_v51  ;;  %v648_v53 = vpop.permute.xlu2 %647  ;;  %v952_v51 = vld [vmem:[%s2554_s5 + $0x30] sm:$0xff] }
 0x1d9   :  { %654 = vst.msk [vmem:[#allocation3 + $0x10] sm:$0xff] %vm532_vm5, %v646_v50  ;;  %1047 = vmatpush.msrb.mxu2 %v952_v51  ;;  %v1015_v51 = vld [vmem:[%s2554_s5 + $0x228] sm:$0xff] }
 0x1da   :  { %679 = vst.msk [vmem:[#allocation3 + $0x38] sm:$0xff] %vm492_vm2, %v672_v52 }
 0x1df   :  { %v630_v54 = vpop.permute.xlu1 %629  ;;  %v614_v55 = vpop.permute.xlu0 %613 }
 0x1e0   :  { %637 = vst.msk [vmem:[#allocation3 + $0x30] sm:$0xff] %vm512_vm4, %v630_v54  ;;  %v719_v56 = vld [vmem:[#allocation3 + $0x10] sm:$0xff]  ;;  %v708_v57 = vpop.permute.xlu2 %707  ;;  %v951_v54 = vld [vmem:[%s2554_s5 + $0x28] sm:$0xff] }
 0x1e1   :  { %655 = vst.msk [vmem:[#allocation3 + $0x30] sm:$0xff] %vm532_vm5, %v648_v53  ;;  %865 = vmatmul.f32.vlgmr.msra.gmra.mxu2 %v719_v56 }
 0x1e2   :  { %620 = vst.msk [vmem:[#allocation3 + $0x50] sm:$0x3] %vm495_vm3, %v614_v55  ;;  %1048 = vmatpush.msrb.mxu2 %v951_v54 }
 0x1e7   :  { %v690_v58 = vpop.permute.xlu1 %689 }
 0x1e8   :  { %697 = vst.msk [vmem:[#allocation3 + $0x38] sm:$0xff] %vm512_vm4, %v690_v58  ;;  %v674_v59 = vpop.permute.xlu0 %673  ;;  %v723_v60 = vld [vmem:[#allocation3 + $0x30] sm:$0xff]  ;;  %v650_v61 = vpop.permute.xlu2 %649 }
 0x1e9   :  { %715 = vst.msk [vmem:[#allocation3 + $0x38] sm:$0xff] %vm532_vm5, %v708_v57  ;;  %868 = vmatmul.f32.gmra.mxu2 %v723_v60  ;;  %v970_v60 = vld [vmem:[%s2554_s5 + $0xc0] sm:$0xff] }
 0x1ea   :  { %680 = vst.msk [vmem:[#allocation3 + $0x58] sm:$0x3] %vm495_vm3, %v674_v59  ;;  %1065 = vmatpush.msrb.mxu3 %v970_v60  ;;  %v1153_v60 = vld [vmem:[%s2556_s7 + $0x70] sm:$0xff] }
 0x1eb   :  { %v814_v3 = vpop.f32.mrf.mxu2 }
 0x1ec   :  { %v815_v10 = vadd.f32 %v1379_v9, %v814_v3  ;;  %v966_v3 = vld [vmem:[%s2554_s5 + $0xa0] sm:$0xff] }
 0x1ef   :  { %v632_v62 = vpop.permute.xlu1 %631 }
 0x1f0   :  { %638 = vst.msk [vmem:[#allocation3 + $0x50] sm:$0x3] %vm515_vm6, %v632_v62  ;;  %v724_v63 = vld [vmem:[#allocation3 + $0x38] sm:$0xff]  ;;  %v710_v1 = vpop.permute.xlu2 %709  ;;  %v969_v62 = vld [vmem:[%s2554_s5 + $0xb8] sm:$0xff] }
 0x1f1   :  { %656 = vst.msk [vmem:[#allocation3 + $0x50] sm:$0x3] %vm535_vm7, %v650_v61  ;;  %894 = vmatmul.f32.gmra.mxu3 %v724_v63  ;;  %v950_v61 = vld [vmem:[%s2554_s5 + $0x20] sm:$0xff]  ;;  %v949_v63 = vld [vmem:[%s2554_s5 + $0x18] sm:$0xff] }
 0x1f2   :  { %1049 = vmatpush.msrb.mxu2 %v950_v61  ;;  %1066 = vmatpush.msrb.mxu3 %v969_v62  ;;  %v1154_v61 = vld [vmem:[%s2556_s7 + $0x78] sm:$0xff]  ;;  %v1151_v62 = vld [vmem:[%s2556_s7 + $0x60] sm:$0xff] }
 0x1f3   :  { %v817_v5 = vpop.f32.mrf.mxu2 }
 0x1f4   :  { %v818_v48 = vadd.f32 %v1379_v9, %v817_v5  ;;  %1050 = vmatpush.msrb.mxu2 %v949_v63  ;;  %v965_v5 = vld [vmem:[%s2554_s5 + $0x98] sm:$0xff]  ;;  %v1152_v63 = vld [vmem:[%s2556_s7 + $0x68] sm:$0xff] }
 0x1f7   :  { %v692_v0 = vpop.permute.xlu1 %691 }
 0x1f8   :  { %698 = vst.msk [vmem:[#allocation3 + $0x58] sm:$0x3] %vm515_vm6, %v692_v0  ;;  %v727_v16 = vld [vmem:[#allocation3 + $0x50] sm:$0x3]  ;;  %v968_v0 = vld [vmem:[%s2554_s5 + $0xb0] sm:$0xff] }
 0x1f9   :  { %716 = vst.msk [vmem:[#allocation3 + $0x58] sm:$0x3] %vm535_vm7, %v710_v1  ;;  %871 = vmatmul.f32.gmra.mxu2 %v727_v16  ;;  %v948_v1 = vld [vmem:[%s2554_s5 + $0x10] sm:$0xff]  ;;  %v967_v16 = vld [vmem:[%s2554_s5 + $0xa8] sm:$0xff]  ;;  %1067 = vmatpush.msrb.mxu3 %v968_v0 }
 0x1fa   :  { %1051 = vmatpush.msrb.mxu2 %v948_v1  ;;  %v1149_v0 = vld [vmem:[%s2556_s7 + $0x50] sm:$0xff]  ;;  %v1150_v1 = vld [vmem:[%s2556_s7 + $0x58] sm:$0xff] }
 0x1fb   :  { %v820_v7 = vpop.f32.mrf.mxu2  ;;  %1068 = vmatpush.msrb.mxu3 %v967_v16  ;;  %v1147_v16 = vld [vmem:[%s2556_s7 + $0x40] sm:$0xff] }
 0x1fc   :  { %v821_v42 = vadd.f32 %v1379_v9, %v820_v7  ;;  %v964_v7 = vld [vmem:[%s2554_s5 + $0x90] sm:$0xff]  ;;  %v963_v9 = vld [vmem:[%s2554_s5 + $0x88] sm:$0xff] }
 0x1fd   :  { %1069 = vmatpush.msrb.mxu3 %v966_v3  ;;  %v1145_v3 = vld [vmem:[%s2556_s7 + $0x30] sm:$0xff] }
 0x1ff   :  { %1070 = vmatpush.msrb.mxu3 %v965_v5  ;;  %v1143_v5 = vld [vmem:[%s2556_s7 + $0x20] sm:$0xff] }
 0x200   :  { %v728_v2 = vld [vmem:[#allocation3 + $0x58] sm:$0x3] }
 0x201   :  { %897 = vmatmul.f32.gmra.mxu3 %v728_v2  ;;  %v947_v2 = vld [vmem:[%s2554_s5 + $0x8] sm:$0xff] }
 0x202   :  { %1052 = vmatpush.msrb.mxu2 %v947_v2  ;;  %1071 = vmatpush.msrb.mxu3 %v964_v7  ;;  %v1148_v2 = vld [vmem:[%s2556_s7 + $0x48] sm:$0xff]  ;;  %v1141_v7 = vld [vmem:[%s2556_s7 + $0x10] sm:$0xff] }
 0x204   :  { %1072 = vmatpush.msrb.mxu3 %v963_v9  ;;  %v1139_v9 = vld [vmem:[%s2556_s7] sm:$0xff] }
 0x214   :  { %v840_v4 = vpop.f32.mrf.mxu3 }
 0x215   :  { %v841_v11 = vadd.f32 %v840_v4, %v815_v10  ;;  %v946_v4 = vld [vmem:[%s2554_s5] sm:$0xff]  ;;  %v991_v10 = vld [vmem:[%s2554_s5 + $0x168] sm:$0xff] }
 0x216   :  { %1053 = vmatpush.msrb.mxu2 %v946_v4  ;;  %v1146_v4 = vld [vmem:[%s2556_s7 + $0x38] sm:$0xff] }
 0x224   :  { %v843_v6 = vpop.f32.mrf.mxu3 }
 0x225   :  { %v844_v43 = vadd.f32 %v843_v6, %v818_v48  ;;  %v993_v6 = vld [vmem:[%s2554_s5 + $0x178] sm:$0xff]  ;;  %v1007_v48 = vld [vmem:[%s2554_s5 + $0x1e8] sm:$0xff] }
 0x226   :  { %1078 = vmatpush.msra.mxu2 %v993_v6  ;;  %v1144_v6 = vld [vmem:[%s2556_s7 + $0x28] sm:$0xff] }
 0x22c   :  { %v2150_v8 = vpop.f32.mrf.mxu3 }
 0x22d   :  { %v847_v50 = vadd.f32 %v2150_v8, %v821_v42  ;;  %v992_v8 = vld [vmem:[%s2554_s5 + $0x170] sm:$0xff]  ;;  %v994_v42 = vld [vmem:[%s2554_s5 + $0x180] sm:$0xff] }
 0x22e   :  { %1079 = vmatpush.msra.mxu2 %v992_v8  ;;  %v1142_v8 = vld [vmem:[%s2556_s7 + $0x18] sm:$0xff] }
 0x230   :  { %1080 = vmatpush.msra.mxu2 %v991_v10  ;;  %v1140_v10 = vld [vmem:[%s2556_s7 + $0x8] sm:$0xff] }
 0x234   :  { %v892_v14 = vpop.f32.mrf.mxu3 }
 0x264   :  { %v866_v12 = vpop.f32.mrf.mxu2 }
 0x265   :  { %v867_v13 = vadd.f32 %v866_v12, %v841_v11  ;;  %v962_v11 = vld [vmem:[%s2554_s5 + $0x80] sm:$0xff] }
 0x266   :  { %v990_v12 = vld [vmem:[%s2554_s5 + $0x160] sm:$0xff]  ;;  %1073 = vmatpush.msrb.mxu3 %v962_v11  ;;  %v1225_v11 = vld [vmem:[%s2558_s9 + $0x78] sm:$0xff] }
 0x267   :  { %v893_v15 = vadd.f32 %v892_v14, %v867_v13  ;;  %v1009_v13 = vld [vmem:[%s2554_s5 + $0x1f8] sm:$0xff]  ;;  %1081 = vmatpush.msra.mxu2 %v990_v12 }
 0x268   :  { %v989_v14 = vld [vmem:[%s2554_s5 + $0x158] sm:$0xff]  ;;  %1098 = vmatpush.msra.mxu3 %v1009_v13  ;;  %v1224_v13 = vld [vmem:[%s2558_s9 + $0x70] sm:$0xff] }
 0x269   :  { %v901_v21 = vmax.f32 %v893_v15, 0.0  ;;  %v1008_v15 = vld [vmem:[%s2554_s5 + $0x1f0] sm:$0xff]  ;;  %1082 = vmatpush.msra.mxu2 %v989_v14  ;;  %v1241_v12 = vld [vmem:[%s2558_s9 + $0xf8] sm:$0xff] }
 0x26a   :  { %1099 = vmatpush.msra.mxu3 %v1008_v15  ;;  %v1240_v14 = vld [vmem:[%s2558_s9 + $0xf0] sm:$0xff]  ;;  %v1223_v15 = vld [vmem:[%s2558_s9 + $0x68] sm:$0xff] }
 0x26b   :  { %905 = vst.msk [vmem:[#allocation4] sm:$0xff] %vm904_vm8, %v901_v21  ;;  %v988_v21 = vld [vmem:[%s2554_s5 + $0x150] sm:$0xff] }
 0x26c   :  { %v869_v17 = vpop.f32.mrf.mxu2  ;;  %1083 = vmatpush.msra.mxu2 %v988_v21  ;;  %1100 = vmatpush.msra.mxu3 %v1007_v48  ;;  %v1239_v21 = vld [vmem:[%s2558_s9 + $0xe8] sm:$0xff]  ;;  %v1222_v48 = vld [vmem:[%s2558_s9 + $0x60] sm:$0xff] }
 0x26d   :  { %v870_v23 = vadd.f32 %v869_v17, %v844_v43  ;;  %v987_v17 = vld [vmem:[%s2554_s5 + $0x148] sm:$0xff]  ;;  %v1006_v43 = vld [vmem:[%s2554_s5 + $0x1e0] sm:$0xff] }
 0x26e   :  { %1084 = vmatpush.msra.mxu2 %v987_v17  ;;  %1101 = vmatpush.msra.mxu3 %v1006_v43  ;;  %v1238_v17 = vld [vmem:[%s2558_s9 + $0xe0] sm:$0xff]  ;;  %v1221_v43 = vld [vmem:[%s2558_s9 + $0x58] sm:$0xff] }
 0x270   :  { %1085 = vmatpush.msra.mxu2 %v986_v18  ;;  %v1237_v18 = vld [vmem:[%s2558_s9 + $0xd8] sm:$0xff] }
 0x272   :  { %v920_v20 = vld [vmem:[#allocation4 + $0x6] sm:$0x3]  ;;  %v911_v22 = vld [vmem:[#allocation4 + $0x2] sm:$0x3]  ;;  %v918_v26 = vld [vmem:[#allocation4 + $0x4] sm:$0x3] }
 0x273   :  { %922 = vrot.lane.b32.xlu1 %v920_v20, %s1411_s29  ;;  %913 = vrot.lane.b32.xlu0 %v911_v22, %s1411_s29  ;;  %919 = vst.msk [vmem:[#allocation5 + $0x2] sm:$0x3] %vm907_vm9, %v918_v26  ;;  %v909_v35 = vld [vmem:[#allocation4] sm:$0x3]  ;;  %v1005_v20 = vld [vmem:[%s2554_s5 + $0x1d8] sm:$0xff] }
 0x274   :  { %v895_v27 = vpop.f32.mrf.mxu3  ;;  %910 = vst.msk [vmem:[#allocation5] sm:$0x3] %vm907_vm9, %v909_v35  ;;  %1102 = vmatpush.msra.mxu3 %v1005_v20  ;;  %v985_v22 = vld [vmem:[%s2554_s5 + $0x138] sm:$0xff]  ;;  %v983_v26 = vld [vmem:[%s2554_s5 + $0x128] sm:$0xff]  ;;  %v1220_v20 = vld [vmem:[%s2558_s9 + $0x50] sm:$0xff] }
 0x275   :  { %v896_v29 = vadd.f32 %v895_v27, %v870_v23  ;;  %v1004_v23 = vld [vmem:[%s2554_s5 + $0x1d0] sm:$0xff]  ;;  %1086 = vmatpush.msra.mxu2 %v985_v22  ;;  %v1002_v27 = vld [vmem:[%s2554_s5 + $0x1c0] sm:$0xff]  ;;  %v999_v35 = vld [vmem:[%s2554_s5 + $0x1a8] sm:$0xff] }
 0x276   :  { %1103 = vmatpush.msra.mxu3 %v1004_v23  ;;  %v1236_v22 = vld [vmem:[%s2558_s9 + $0xd0] sm:$0xff]  ;;  %v1380_v23 = vld [vmem:[%s2555_s6] ss:$0 sm:$0xff] }
 0x277   :  { %v902_v32 = vmax.f32 %v896_v29, 0.0  ;;  %1087 = vmatpush.msra.mxu2 %v984_v24  ;;  %v1001_v29 = vld [vmem:[%s2554_s5 + $0x1b8] sm:$0xff]  ;;  %v1219_v24 = vld [vmem:[%s2558_s9 + $0x48] sm:$0xff] }
 0x278   :  { %1104 = vmatpush.msra.mxu3 %v1003_v25  ;;  %v1235_v25 = vld [vmem:[%s2558_s9 + $0xc8] sm:$0xff] }
 0x279   :  { %906 = vst.msk [vmem:[#allocation4 + $0x8] sm:$0xff] %vm904_vm8, %v902_v32  ;;  %1088 = vmatpush.msra.mxu2 %v983_v26  ;;  %v980_v32 = vld [vmem:[%s2554_s5 + $0x110] sm:$0xff] }
 0x27a   :  { %1105 = vmatpush.msra.mxu3 %v1002_v27  ;;  %v1218_v27 = vld [vmem:[%s2558_s9 + $0x40] sm:$0xff] }
 0x27b   :  { %1089 = vmatpush.msra.mxu2 %v982_v28  ;;  %v1234_v28 = vld [vmem:[%s2558_s9 + $0xc0] sm:$0xff] }
 0x27c   :  { %v872_v45 = vpop.f32.mrf.mxu2  ;;  %1106 = vmatpush.msra.mxu3 %v1001_v29 }
 0x27d   :  { %v873_v53 = vadd.f32 %v872_v45, %v847_v50  ;;  %1090 = vmatpush.msra.mxu2 %v981_v30  ;;  %v1016_v50 = vld [vmem:[%s2554_s5 + $0x230] sm:$0xff]  ;;  %v1217_v30 = vld [vmem:[%s2558_s9 + $0x38] sm:$0xff] }
 0x27e   :  { %1107 = vmatpush.msra.mxu3 %v1000_v31  ;;  %v1233_v31 = vld [vmem:[%s2558_s9 + $0xb8] sm:$0xff] }
 0x27f   :  { %1091 = vmatpush.msra.mxu2 %v980_v32 }
 0x280   :  { %v928_v46 = vld [vmem:[#allocation4 + $0xa] sm:$0x3]  ;;  %v936_v47 = vld [vmem:[#allocation4 + $0xe] sm:$0x3]  ;;  %v926_v49 = vld [vmem:[#allocation4 + $0x8] sm:$0x3]  ;;  %1108 = vmatpush.msra.mxu3 %v999_v35 }
 0x281   :  { %930 = vrot.lane.b32.xlu2 %v928_v46, %s1411_s29  ;;  %938 = vrot.lane.b32.xlu0 %v936_v47, %s1411_s29  ;;  %927 = vst.msk [vmem:[#allocation5 + $0x4] sm:$0x3] %vm907_vm9, %v926_v49  ;;  %v934_v52 = vld [vmem:[#allocation4 + $0xc] sm:$0x3]  ;;  %v1017_v46 = vld [vmem:[%s2554_s5 + $0x238] sm:$0xff] }
 0x282   :  { %935 = vst.msk [vmem:[#allocation5 + $0x6] sm:$0x3] %vm907_vm9, %v934_v52  ;;  %1092 = vmatpush.msra.mxu2 %v979_v36  ;;  %1109 = vmatpush.msra.mxu3 %v998_v37  ;;  %v1014_v52 = vld [vmem:[%s2554_s5 + $0x220] sm:$0xff]  ;;  %v1215_v36 = vld [vmem:[%s2558_s9 + $0x28] sm:$0xff] }
 0x283   :  { %v1231_v37 = vld [vmem:[%s2558_s9 + $0xa8] sm:$0xff] }
 0x284   :  { %v898_v55 = vpop.f32.mrf.mxu3  ;;  %1093 = vmatpush.msra.mxu2 %v978_v38  ;;  %1110 = vmatpush.msra.mxu3 %v997_v39  ;;  %v1214_v39 = vld [vmem:[%s2558_s9 + $0x20] sm:$0xff] }
 0x285   :  { %v899_v56 = vadd.f32 %v898_v55, %v873_v53  ;;  %v1013_v53 = vld [vmem:[%s2554_s5 + $0x218] sm:$0xff] }
 0x286   :  { %1111 = vmatpush.msra.mxu3 %v996_v40  ;;  %v1230_v40 = vld [vmem:[%s2558_s9 + $0xa0] sm:$0xff] }
 0x287   :  { %v903_v57 = vmax.f32 %v899_v56, 0.0  ;;  %v1012_v56 = vld [vmem:[%s2554_s5 + $0x210] sm:$0xff] }
 0x288   :  { %1112 = vmatpush.msra.mxu3 %v995_v41 }
 0x289   :  { %908 = vst.msk [vmem:[#allocation4 + $0x10] sm:$0x3] %vm907_vm9, %v903_v57  ;;  %v1011_v57 = vld [vmem:[%s2554_s5 + $0x208] sm:$0xff] }
 0x28a   :  { %1113 = vmatpush.msra.mxu3 %v994_v42  ;;  %v1213_v42 = vld [vmem:[%s2558_s9 + $0x18] sm:$0xff] }
 0x290   :  { %v942_v58 = vld [vmem:[#allocation4 + $0x10] sm:$0x3] }
 0x291   :  { %943 = vst.msk [vmem:[#allocation5 + $0x8] sm:$0x3] %vm907_vm9, %v942_v58  ;;  %v1010_v58 = vld [vmem:[%s2554_s5 + $0x200] sm:$0xff] }
 0x298   :  { %v945_v59 = vld [vmem:[#allocation5 + $0x8] sm:$0x3] }
 0x299   :  { %1026 = vst [vmem:[#allocation1 + $0x20] ss:$4 sm:$0xff] %v945_v59 }
 0x2a0   :  { %v1031_v59 = vld.sshfl [vmem:[#allocation1 + $0x20] sm:$0xff pattern:$0x73625140] }
 0x2db   :  { %v931_v19 = vpop.permute.xlu2 %930 }
 0x2dc   :  { %933 = vst.msk [vmem:[#allocation5 + $0x4] sm:$0x3] %vm916_vm10, %v931_v19 }
 0x2e5   :  { %v923_v33 = vpop.permute.xlu1 %922  ;;  %v914_v34 = vpop.permute.xlu0 %913 }
 0x2e6   :  { %925 = vst.msk [vmem:[#allocation5 + $0x2] sm:$0x3] %vm916_vm10, %v923_v33  ;;  %v1216_v33 = vld [vmem:[%s2558_s9 + $0x30] sm:$0xff] }
 0x2e7   :  { %917 = vst.msk [vmem:[#allocation5] sm:$0x3] %vm916_vm10, %v914_v34  ;;  %v1232_v34 = vld [vmem:[%s2558_s9 + $0xb0] sm:$0xff] }
 0x2f3   :  { %v939_v44 = vpop.permute.xlu0 %938 }
 0x2f4   :  { %941 = vst.msk [vmem:[#allocation5 + $0x6] sm:$0x3] %vm916_vm10, %v939_v44  ;;  %v1229_v44 = vld [vmem:[%s2558_s9 + $0x98] sm:$0xff] }
 0x2fb   :  { %v944_v45 = vld [vmem:[#allocation5] sm:$0xff] }
 0x2fc   :  { %1024 = vst [vmem:[#allocation1] ss:$4 sm:$0xff] %v944_v45 }
 0x303   :  { %v1027_v47 = vld.sshfl [vmem:[#allocation1] sm:$0xff pattern:$0x73625140]  ;;  %v1028_v49 = vld.sshfl [vmem:[#allocation1 + $0x8] sm:$0xff pattern:$0x73625140] }
 0x304   :  { %1054 = vmatmul.f32.vlgmr.msrb.gmra.mxu2 %v1027_v47  ;;  %1074 = vmatmul.f32.vlgmr.msrb.gmra.mxu3 %v1028_v49  ;;  %v1029_v54 = vld.sshfl [vmem:[#allocation1 + $0x10] sm:$0xff pattern:$0x73625140]  ;;  %v1030_v55 = vld.sshfl [vmem:[#allocation1 + $0x18] sm:$0xff pattern:$0x73625140] }
 0x305   :  { %1126 = vmatpush.msrb.mxu2 %v1017_v46  ;;  %1172 = vmatpush.msrb.mxu3 %v1153_v60 }
 0x307   :  { %1127 = vmatpush.msrb.mxu2 %v1016_v50  ;;  %1173 = vmatpush.msrb.mxu3 %v1151_v62  ;;  %v1212_v50 = vld [vmem:[%s2558_s9 + $0x10] sm:$0xff] }
 0x309   :  { %1128 = vmatpush.msrb.mxu2 %v1015_v51  ;;  %1174 = vmatpush.msrb.mxu3 %v1149_v0  ;;  %v1228_v51 = vld [vmem:[%s2558_s9 + $0x90] sm:$0xff] }
 0x30b   :  { %1129 = vmatpush.msrb.mxu2 %v1014_v52  ;;  %1175 = vmatpush.msrb.mxu3 %v1147_v16  ;;  %v1211_v52 = vld [vmem:[%s2558_s9 + $0x8] sm:$0xff] }
 0x30c   :  { %1094 = vmatmul.f32.vlgmr.msra.gmra.mxu2 %v1029_v54  ;;  %1114 = vmatmul.f32.vlgmr.msra.gmra.mxu3 %v1030_v55  ;;  %v1210_v54 = vld [vmem:[%s2558_s9] sm:$0xff] }
 0x30d   :  { %1130 = vmatpush.msrb.mxu2 %v1013_v53  ;;  %1176 = vmatpush.msrb.mxu3 %v1145_v3  ;;  %v1227_v53 = vld [vmem:[%s2558_s9 + $0x88] sm:$0xff]  ;;  %v1226_v55 = vld [vmem:[%s2558_s9 + $0x80] sm:$0xff] }
 0x30e   :  { %v1381_v3 = vld [vmem:[%s2559_s10] ss:$0 sm:$0xff] }
 0x30f   :  { %1131 = vmatpush.msrb.mxu2 %v1012_v56  ;;  %1177 = vmatpush.msrb.mxu3 %v1143_v5  ;;  %v1155_v56 = vld [vmem:[%s2557_s8] sm:$0x3] }
 0x311   :  { %1132 = vmatpush.msrb.mxu2 %v1011_v57  ;;  %1178 = vmatpush.msrb.mxu3 %v1141_v7  ;;  %v1157_v57 = vperm.slane %v1155_v56, 0 }
 0x313   :  { %1133 = vmatpush.msrb.mxu2 %v1010_v58  ;;  %1179 = vmatpush.msrb.mxu3 %v1139_v9  ;;  %v1158_v58 = vperm.slane %v1155_v56, 1  ;;  %v1414_v9 = vmov 12.0  }
 0x314   :  { %1331 = vmatmul.msk.f32.vlgmr.msrb.gmra.mxu2 %vm904_vm8, %v1031_v59  ;;  %1382 = vrcp.f32 %v1414_v9 }
 0x315   :  { %1192 = vmatpush.msra.mxu2 %v1154_v61  ;;  %1246 = vmatpush.msra.mxu3 %v1225_v11 }
 0x317   :  { %1193 = vmatpush.msra.mxu2 %v1152_v63  ;;  %1247 = vmatpush.msra.mxu3 %v1224_v13 }
 0x319   :  { %1194 = vmatpush.msra.mxu2 %v1150_v1  ;;  %1248 = vmatpush.msra.mxu3 %v1223_v15 }
 0x31b   :  { %1195 = vmatpush.msra.mxu2 %v1148_v2  ;;  %1249 = vmatpush.msra.mxu3 %v1222_v48  ;;  %v1413_v2 = vmov 6  }
 0x31c   :  { %1376 = vset.pattern.permute.xlu2 %v1413_v2  ;;  %1377 = vset.pattern.permute.xlu0 %v1413_v2 }
 0x31d   :  { %1196 = vmatpush.msra.mxu2 %v1146_v4  ;;  %1250 = vmatpush.msra.mxu3 %v1221_v43 }
 0x31f   :  { %1197 = vmatpush.msra.mxu2 %v1144_v6  ;;  %1251 = vmatpush.msra.mxu3 %v1220_v20 }
 0x321   :  { %1198 = vmatpush.msra.mxu2 %v1142_v8  ;;  %1252 = vmatpush.msra.mxu3 %v1219_v24 }
 0x323   :  { %1199 = vmatpush.msra.mxu2 %v1140_v10  ;;  %1253 = vmatpush.msra.mxu3 %v1218_v27  ;;  %v1383_v10 = vpop.eup %1382 }
 0x324   :  { %v1298_v11 = vmul.f32 12.0, %v1383_v10  ;;  %vm1302_vm14 = vweird.f32 %v1383_v10 }
 0x325   :  { %1266 = vmatpush.msrb.mxu2 %v1241_v12  ;;  %1254 = vmatpush.msra.mxu3 %v1217_v30 }
 0x326   :  { %v1299_v12 = vsub.f32 1.0, %v1298_v11 }
 0x327   :  { %1267 = vmatpush.msrb.mxu2 %v1240_v14  ;;  %1255 = vmatpush.msra.mxu3 %v1216_v33 }
 0x329   :  { %1268 = vmatpush.msrb.mxu2 %v1239_v21  ;;  %1256 = vmatpush.msra.mxu3 %v1215_v36  ;;  %v1300_v21 = vmul.f32 %v1383_v10, %v1299_v12 }
 0x32b   :  { %1269 = vmatpush.msrb.mxu2 %v1238_v17  ;;  %1257 = vmatpush.msra.mxu3 %v1214_v39  ;;  %v1301_v43 = vadd.f32 %v1383_v10, %v1300_v21 }
 0x32d   :  { %1270 = vmatpush.msrb.mxu2 %v1237_v18  ;;  %1258 = vmatpush.msra.mxu3 %v1213_v42  ;;  %v1303_v20 = vsel %vm1302_vm14, %v1383_v10, %v1301_v43 }
 0x32f   :  { %1271 = vmatpush.msrb.mxu2 %v1236_v22  ;;  %1259 = vmatpush.msra.mxu3 %v1212_v50 }
 0x331   :  { %1272 = vmatpush.msrb.mxu2 %v1235_v25  ;;  %1260 = vmatpush.msra.mxu3 %v1211_v52 }
 0x333   :  { %1273 = vmatpush.msrb.mxu2 %v1234_v28  ;;  %1261 = vmatpush.msra.mxu3 %v1210_v54 }
 0x335   :  { %1274 = vmatpush.msrb.mxu2 %v1233_v31 }
 0x337   :  { %1275 = vmatpush.msrb.mxu2 %v1232_v34 }
 0x339   :  { %1276 = vmatpush.msrb.mxu2 %v1231_v37 }
 0x33b   :  { %1277 = vmatpush.msrb.mxu2 %v1230_v40 }
 0x33d   :  { %1278 = vmatpush.msrb.mxu2 %v1229_v44 }
 0x33f   :  { %1279 = vmatpush.msrb.mxu2 %v1228_v51 }
 0x341   :  { %1280 = vmatpush.msrb.mxu2 %v1227_v53 }
 0x343   :  { %1281 = vmatpush.msrb.mxu2 %v1226_v55 }
 0x387   :  { %v1055_v19 = vpop.f32.mrf.mxu2  ;;  %v1075_v26 = vpop.f32.mrf.mxu3 }
 0x388   :  { %v1056_v29 = vadd.f32 %v1380_v23, %v1055_v19 }
 0x38a   :  { %v1076_v35 = vadd.f32 %v1075_v26, %v1056_v29 }
 0x38f   :  { %v1095_v32 = vpop.f32.mrf.mxu2  ;;  %v1115_v41 = vpop.f32.mrf.mxu3 }
 0x390   :  { %v1096_v38 = vadd.f32 %v1095_v32, %v1076_v35 }
 0x392   :  { %v1116_v45 = vadd.f32 %v1115_v41, %v1096_v38 }
 0x397   :  { %v1135_v46 = vpop.f32.mrf.mxu2 }
 0x398   :  { %v1136_v47 = vadd.f32 %v1135_v46, %v1116_v45 }
 0x39a   :  { %v1138_v49 = vmax.f32 %v1136_v47, 0.0 }
 0x39c   :  { %1332 = vmatmul.msk.f32.vlgmr.msrb.gmra.mxu3 %vm904_vm8, %v1138_v49  ;;  %1333 = vmatmul.msk.f32.vlgmr.msra.gmra.mxu2 %vm904_vm8, %v1138_v49 }
 0x41f   :  { %v1181_v59 = vpop.f32.mrf.mxu3  ;;  %v1201_v60 = vpop.f32.mrf.mxu2 }
 0x420   :  { %v1182_v61 = vadd.f32 %v1181_v59, %v1157_v57  ;;  %v1202_v62 = vadd.f32 %v1201_v60, %v1158_v58 }
 0x422   :  { %vm1204_vm11 = vcmp.gt.f32.partialorder %v1182_v61, 0.0  ;;  %v1206_v63 = vmul.f32 0.01, %v1182_v61  ;;  %vm1205_vm12 = vcmp.gt.f32.partialorder %v1202_v62, 0.0  ;;  %v1207_v0 = vmul.f32 0.01, %v1202_v62 }
 0x424   :  { %v1208_v1 = vsel %vm1204_vm11, %v1182_v61, %v1206_v63  ;;  %v1209_v16 = vsel %vm1205_vm12, %v1202_v62, %v1207_v0 }
 0x425   :  { %1262 = vmatmul.f32.vlgmr.msra.gmra.mxu3 %v1208_v1  ;;  %1282 = vmatmul.f32.vlgmr.msrb.gmra.mxu2 %v1209_v16 }
 0x4a8   :  { %v1263_v4 = vpop.f32.mrf.mxu3  ;;  %v1283_v6 = vpop.f32.mrf.mxu2 }
 0x4a9   :  { %v1264_v5 = vadd.f32 %v1381_v3, %v1263_v4 }
 0x4ab   :  { %v1284_v7 = vadd.f32 %v1283_v6, %v1264_v5 }
 0x4ad   :  { %1310 = vperm.xlu2 %1376, %v1284_v7   ;;  %v1287_v8 = vsel %vm1286_vm13, %v1284_v7, 0.0 }
 0x4ae   :  { %1288 = vadd.xlane.f32.xlu1 %v1287_v8 }
 0x507   :  { %v1311_v24 = vpop.permute.xlu2 %1310 }
 0x521   :  { %v1289_v13 = vpop.xlane.xlu1 %1288 }
 0x522   :  { %v1290_v14 = vrot.slane %v1289_v13, 4 }
 0x524   :  { %v1291_v15 = vadd.f32 %v1290_v14, %v1289_v13 }
 0x526   :  { %v1292_v48 = vrot.slane %v1291_v15, 2 }
 0x528   :  { %v1293_v17 = vadd.f32 %v1292_v48, %v1291_v15 }
 0x52a   :  { %v1294_v18 = vrot.slane %v1293_v17, 1 }
 0x52c   :  { %v1295_v19 = vadd.f32 %v1294_v18, %v1293_v17 }
 0x52e   :  { %1366 = vpush %v1295_v19 }
 0x52f   :  { %1368 = vpush %v1303_v20 }
 0x55f   :  { %s1367_s8 = spop %1366 }
 0x560   :  { %s1369_s10 = spop %1368 }
 0x561   :  { %s1305_s20 = smul.f32 %s1369_s10, %s1367_s8 }
 0x563   :  { %v1306_v22 = vstv %s1305_s20 }
 0x564   :  { %v1307_v23 = vsub.f32 %v1284_v7, %v1306_v22 }
 0x566   :  { %v1313_v25 = vadd.f32 %v1311_v24, %v1307_v23 }
 0x568   :  { %1314 = vst.msk [vmem:[#allocation6] sm:$0x3] %vm1286_vm13, %v1313_v25 }
 0x569   :  { %1325 = dma.vmem_to_hbm [thread:$0]  %s1321_s22, 32, %s1323_s25, [#allocation7]  }
 0x56a   :  { %1408 = dma.done.wait [#allocation7], 32  }
 0x56b   :  { %1409 = vsyncadd [#allocation7], 4294967264 }
 0x56c   :  { %1330 = vsyncpa [#allocation7], 1 }

</bundles_post_ra>
